<compile_context>
chip_gen: v7x
topology: tpu7x:2x2x1
jax: 0.10.0
libtpu: 0.0.40
codegen_flags: <defaults>
</compile_context>

<pallas_src>
import numpy as np
import jax
import jax.numpy as jnp
from jax import lax
from jax.experimental import pallas as pl
from jax.experimental.pallas import tpu as pltpu

# ---------------- model hyper-parameters (small, consistent with the module) ------------
N, C_IN, C_OUT, L = 2, 16, 32, 16
NL = N * L
K = 3                      # conv1/conv2 kernel size, padding = 1
KSP = 7                    # spatial-attention kernel size, padding = 3
RED = 16                   # reduction_ratio
HID = C_OUT // RED         # = 2
BN_EPS = 1e-5
NPAD = 32                  # sample dim padded to 32 rows for the pooling/replication matmuls
assert L & (L - 1) == 0    # the in-kernel boundary mask uses `row & (L - 1)`
assert NL == C_OUT and NPAD == C_OUT   # packing assumes one common 32-lane width

# MultiStepEIFNode defaults.  With mem initialised to zeros the node reduces to
#   mem   = (x + rest + delta_T * exp(-theta_rh / delta_T)) / tau
#   spike = (mem >= threshold).float()
# With tau > 0 this is the single compare  x >= tau*threshold - EIF_BIAS, and the preceding
# BatchNorm/bias fold into the weights / that threshold.
EIF_THRESHOLD = 1.0
EIF_REST = 0.0
EIF_TAU = 1.0
EIF_DELTA_T = 1.0
EIF_THETA_RH = 0.8
EIF_BIAS = EIF_REST + EIF_DELTA_T * float(np.exp(-EIF_THETA_RH / EIF_DELTA_T))
SPIKE_T = EIF_TAU * EIF_THRESHOLD - EIF_BIAS

# __init__ sets these gates to 0; we pick deterministic non-zero values so the attention
# path is actually exercised (shapes unchanged).
CHANNEL_GATE = 0.75
SPATIAL_GATE = 0.5

# ---- packed-parameter row offsets (every segment is a multiple of 8 sublanes, 32 lanes) --
SEG_W1 = K * C_IN                    # 48
SEG_W2 = K * C_OUT                   # 96
OFF_W1 = 0                           # (48, 32)  conv1 weight * bn1 scale
OFF_W2H = OFF_W1 + SEG_W1            # (96, 32)  conv2 weight * bn2 scale, bf16-hi part
OFF_W2L = OFF_W2H + SEG_W2           # (96, 32)  conv2 weight * bn2 scale, f32 residual part
OFF_WSC = OFF_W2L + SEG_W2           # (16, 32)  shortcut 1x1 weight * bnsc scale
OFF_WCA1 = OFF_WSC + C_IN            # (32, 32)  channel-att squeeze (lanes >= HID zero)
OFF_WCA2 = OFF_WCA1 + C_OUT          # (32, 32)  channel-att excite (rows >= HID zero)
OFF_WSPT = OFF_WCA2 + C_OUT          # (32, 32)  spatial-att weight, taps on lanes (>=KSP zero)
OFF_PPL = OFF_WSPT + C_OUT           # (32, 32)  per-sample average-pool matrix (rows >= N zero)
OFF_BRP = OFF_PPL + NPAD             # (32, 32)  per-sample replication matrix (lanes >= N zero)
OFF_VEC = OFF_BRP + NL               # (8, 32)   rows: thr1, thr2, bsc, bca1, bca2, bsp, 0, 0
PK_ROWS = OFF_VEC + 8                # 424
for _off in (OFF_W1, OFF_W2H, OFF_W2L, OFF_WSC, OFF_WCA1, OFF_WCA2,
             OFF_WSPT, OFF_PPL, OFF_BRP, OFF_VEC, PK_ROWS):
    assert _off % 8 == 0

HIGH = lax.Precision.HIGHEST

# TODO(synk): BatchNorm1d is implemented in inference mode (running stats), not the
#             batch-statistics training-mode path.
# TODO(synk): Grad-CAM bookkeeping (features.clone(), register_hook/save_gradient) is
#             backward-only and has no forward effect; it is omitted.


def _sigmoid(x):
    # exp rides the EUP slot; the approximate reciprocal also goes to the EUP instead of
    # putting a true divide on the VPU critical path.
    return pl.reciprocal(1.0 + jnp.exp(-x), approx=True)


def conv_sab_kernel(x_ref, pk_ref, out_ref):
    f32 = jnp.float32
    x = x_ref[...]                                           # (N*L, C_IN)

    # ---- packed parameters: static, 8-row-aligned slices of one VMEM-resident array ----
    w1 = pk_ref[OFF_W1:OFF_W1 + SEG_W1, :]
    w2h = pk_ref[OFF_W2H:OFF_W2H + SEG_W2, :]
    w2l = pk_ref[OFF_W2L:OFF_W2L + SEG_W2, :]
    wsc = pk_ref[OFF_WSC:OFF_WSC + C_IN, :]
    wca1 = pk_ref[OFF_WCA1:OFF_WCA1 + C_OUT, :]
    wca2 = pk_ref[OFF_WCA2:OFF_WCA2 + C_OUT, :]
    wspt = pk_ref[OFF_WSPT:OFF_WSPT + C_OUT, :]
    ppool = pk_ref[OFF_PPL:OFF_PPL + NPAD, :]
    brep = pk_ref[OFF_BRP:OFF_BRP + NL, :]
    vec = pk_ref[OFF_VEC:OFF_VEC + 8, :]                     # one aligned 8-row load
    thr1, thr2 = vec[0:1, :], vec[1:2, :]
    bsc, bca1 = vec[2:3, :], vec[3:4, :]
    bca2, bsp = vec[4:5, :], vec[5:6, :]

    # ---- hoisted boundary masks (6 distinct) + lane index, computed once ----
    row = lax.broadcasted_iota(jnp.int32, (NL, 1), 0)
    l_idx = jnp.bitwise_and(row, L - 1)                      # == row % L  (L power of 2)
    keep = {d: (l_idx < L - d) if d > 0 else (l_idx >= -d)
            for d in (-3, -2, -1, 1, 2, 3)}
    lane = lax.broadcasted_iota(jnp.int32, (1, C_OUT), 1)

    def shift_rows(v, d):
        """y[r] = v[r + d] when row r + d lies in the same sample, else 0 (conv zero pad)."""
        if d == 0:
            return v
        z = jnp.zeros((abs(d), v.shape[1]), v.dtype)
        if d > 0:
            y = jnp.concatenate([v[d:], z], axis=0)
        else:
            y = jnp.concatenate([z, v[:NL + d]], axis=0)
        return jnp.where(keep[d], y, 0.0)

    # ---- conv1 + bn1 + EIF spike: in-register im2col, one HIGHEST matmul + compare ----
    # HIGHEST stays here: x is general f32 and the spike compare discretizes the value, so
    # bf16 MXU rounding could flip spikes vs. the f32 reference.
    col1 = jnp.concatenate([shift_rows(x, d) for d in (-1, 0, 1)], axis=1)     # (N*L, 3*C_IN)
    spk1 = (jnp.dot(col1, w1, precision=HIGH, preferred_element_type=f32)
            >= thr1).astype(f32)                                               # (N*L, C_OUT)

    # ---- conv2 + bn2 + EIF spike: spikes are exact in bf16, so the folded weight is split
    # host-side into bf16-hi + f32-lo parts -> two DEFAULT single-pass matmuls reproduce
    # HIGHEST-class accuracy at a fraction of the MXU passes.
    col2 = jnp.concatenate([shift_rows(spk1, d) for d in (-1, 0, 1)], axis=1)  # (N*L, 3*C_OUT)
    pre2 = (jnp.dot(col2, w2h, preferred_element_type=f32)
            + jnp.dot(col2, w2l, preferred_element_type=f32))
    spk2 = (pre2 >= thr2).astype(f32)                                          # (N*L, C_OUT)

    # ---- shortcut: 1x1 conv + BN (folded), DEFAULT precision (continuous output) ----
    res = jnp.dot(x, wsc, preferred_element_type=f32) + bsc                    # (N*L, C_OUT)

    # ---- channel attention: avg pool and per-sample broadcast as constant matmuls on the
    # otherwise-idle MXU (pool entries 1/L and replication 0/1 are exact in bf16).
    avg = jnp.dot(ppool, spk2, preferred_element_type=f32)                     # (NPAD, C_OUT)
    hca = jnp.maximum(jnp.dot(avg, wca1, preferred_element_type=f32) + bca1, 0.0)
    ca = _sigmoid(jnp.dot(hca, wca2, preferred_element_type=f32) + bca2)       # (NPAD, C_OUT)
    ca_rows = jnp.dot(brep, ca, preferred_element_type=f32)                    # (N*L, C_OUT)

    # ---- spatial attention: conv1d(C_OUT -> 1, k=7, pad=3).  y puts the 7 taps on lanes;
    # 7 masked sublane shifts pick tap k from row r+k-3; the ones-matrix matmul performs the
    # lane-sum AND the broadcast across channels in a single tiny MXU op.
    y = jnp.dot(spk2, wspt, preferred_element_type=f32)        # (N*L, C_OUT), lanes >= KSP zero
    s_acc = jnp.where(lane == KSP // 2, y, 0.0)                # tap k=3 (d=0)
    for k in range(KSP):
        d = k - KSP // 2
        if d != 0:
            s_acc = s_acc + jnp.where(lane == k, shift_rows(y, d), 0.0)
    ones_cc = jnp.ones((C_OUT, C_OUT), f32)
    sp = _sigmoid(jnp.dot(s_acc, ones_cc, preferred_element_type=f32) + bsp)   # (N*L, C_OUT)

    out_ref[...] = spk2 * (CHANNEL_GATE * ca_rows + SPATIAL_GATE * sp) + res


@jax.jit
def conv_sab(x_ncl, packed):
    """x_ncl: (N, C_IN, L) float32, PyTorch Conv1d layout.  Returns (N, C_OUT, L)."""
    # Only a layout transpose remains in the wrapper; the im2col window is built in-kernel.
    x_rows = jnp.transpose(x_ncl, (0, 2, 1)).astype(jnp.float32).reshape(NL, C_IN)
    vmem = pl.BlockSpec(memory_space=pltpu.MemorySpace.VMEM)
    # NOTE(v7x): this single-invocation kernel uses one TensorCore.  If a real workload has
    # an outer dimension (spiking-net timesteps, more samples, several ConvSAB blocks),
    # expose it as a leading grid axis with dimension_semantics=("parallel", ...) so both
    # v7x TensorCores are used; at this fixed spec there is no such axis.
    out = pl.pallas_call(              # single invocation: no grid, whole arrays in VMEM
        conv_sab_kernel,
        out_shape=jax.ShapeDtypeStruct((NL, C_OUT), jnp.float32),
        in_specs=[vmem, vmem],
        out_specs=vmem,
    )(x_rows, packed)
    return jnp.transpose(out.reshape(N, L, C_OUT), (0, 2, 1))        # back to NCL


# ----------------------------- parameter folding / packing ------------------------------
def pack_params(p):
    """Fold BN + conv bias + EIF constants into weights / per-channel spike thresholds and
    pack every parameter (plus the pooling / replication matrices) into one
    (PK_ROWS, C_OUT) array.  BN scale is folded multiplicatively into the weight/bias side
    of the compare (never divided into the threshold), so its sign cannot flip spikes."""
    s1, h1 = p["bn1_scale"], p["bn1_shift"]
    s2, h2 = p["bn2_scale"], p["bn2_shift"]
    ssc, hsc = p["bnsc_scale"], p["bnsc_shift"]

    w1f = p["w1"].reshape(K * C_IN, C_OUT) * s1
    thr1 = SPIKE_T - (p["b1"] * s1 + h1)

    w2f = p["w2"].reshape(K * C_OUT, C_OUT) * s2
    w2_hi = w2f.astype(jnp.bfloat16).astype(jnp.float32)      # exact in bf16
    w2_lo = w2f - w2_hi                                       # small residual part
    thr2 = SPIKE_T - (p["b2"] * s2 + h2)

    wscf = p["wsc"] * ssc
    bscf = p["bsc"] * ssc + hsc

    wca1p = jnp.zeros((C_OUT, C_OUT), jnp.float32).at[:, :HID].set(p["wca1"])
    bca1p = jnp.zeros((1, C_OUT), jnp.float32).at[:, :HID].set(p["bca1"])
    wca2p = jnp.zeros((C_OUT, C_OUT), jnp.float32).at[:HID, :].set(p["wca2"])

    # spatial-attention weight with the 7 taps on lanes: wspt[c, k] = w_sp[c, k]
    wspt = jnp.zeros((C_OUT, C_OUT), jnp.float32).at[:, :KSP].set(p["wsp"].T)
    bsp_row = jnp.full((1, C_OUT), p["bsp"][0, 0], jnp.float32)

    # constant pooling / replication matrices (entries 1/L and 0/1, exact in bf16)
    ppool = np.zeros((NPAD, NL), np.float32)
    brep = np.zeros((NL, NPAD), np.float32)
    for n in range(N):
        ppool[n, n * L:(n + 1) * L] = 1.0 / L
        brep[n * L:(n + 1) * L, n] = 1.0

    vec = jnp.concatenate([thr1, thr2, bscf, bca1p, p["bca2"], bsp_row,
                           jnp.zeros((2, C_OUT), jnp.float32)], axis=0)       # (8, C_OUT)
    pk = jnp.concatenate([w1f, w2_hi, w2_lo, wscf, wca1p, wca2p, wspt,
                          jnp.asarray(ppool), jnp.asarray(brep), vec], axis=0)
    assert pk.shape == (PK_ROWS, C_OUT)
    return pk


# ----------------------------- deterministic parameter init -----------------------------
def init_params(key):
    ks = jax.random.split(key, 12)

    def kaiming(k, shape, fan_out):
        return jnp.sqrt(2.0 / fan_out) * jax.random.normal(k, shape, jnp.float32)

    p = {}
    # conv1: torch weight (C_OUT, C_IN, 3) stored transposed as (3, C_IN, C_OUT) for x @ W
    p["w1"] = kaiming(ks[0], (K, C_IN, C_OUT), C_OUT * K)
    p["b1"] = 0.1 * jax.random.normal(ks[1], (1, C_OUT), jnp.float32)
    p["w2"] = kaiming(ks[2], (K, C_OUT, C_OUT), C_OUT * K)
    p["b2"] = 0.1 * jax.random.normal(ks[3], (1, C_OUT), jnp.float32)
    # shortcut 1x1 conv (in_channels != out_channels)
    p["wsc"] = kaiming(ks[4], (C_IN, C_OUT), C_OUT)
    p["bsc"] = 0.1 * jax.random.normal(ks[5], (1, C_OUT), jnp.float32)
    # BatchNorm1d (inference mode): gamma=1, beta=0, running_mean=0, running_var=1
    bn_scale = jnp.full((1, C_OUT), 1.0 / np.sqrt(1.0 + BN_EPS), jnp.float32)
    bn_shift = jnp.zeros((1, C_OUT), jnp.float32)
    for name in ("bn1", "bn2", "bnsc"):
        p[name + "_scale"] = bn_scale
        p[name + "_shift"] = bn_shift
    # channel attention 1x1 convs
    p["wca1"] = kaiming(ks[6], (C_OUT, HID), HID)
    p["bca1"] = 0.1 * jax.random.normal(ks[7], (1, HID), jnp.float32)
    p["wca2"] = kaiming(ks[8], (HID, C_OUT), C_OUT)
    p["bca2"] = 0.1 * jax.random.normal(ks[9], (1, C_OUT), jnp.float32)
    # spatial attention conv: torch weight (1, C_OUT, 7) stored as (7, C_OUT)
    p["wsp"] = kaiming(ks[10], (KSP, C_OUT), KSP)
    p["bsp"] = 0.1 * jax.random.normal(ks[11], (1, 1), jnp.float32)
    return p


# ----------------------------- pure-JAX reference (NCL layout) --------------------------
def _torch_conv1d(x_ncl, w_oik, b, pad):
    out = lax.conv_general_dilated(
        x_ncl, w_oik, window_strides=(1,), padding=[(pad, pad)],
        dimension_numbers=("NCH", "OIH", "NCH"), precision=HIGH)
    return out + b[None, :, None]


def reference_forward(x, p):
    def bn(y, scale, shift):
        return y * scale.reshape(1, -1, 1) + shift.reshape(1, -1, 1)

    def spike(y):
        return ((y + EIF_BIAS) / EIF_TAU >= EIF_THRESHOLD).astype(jnp.float32)

    w1 = jnp.transpose(p["w1"], (2, 1, 0))
    w2 = jnp.transpose(p["w2"], (2, 1, 0))
    wsc = jnp.transpose(p["wsc"], (1, 0))[:, :, None]
    wca1 = jnp.transpose(p["wca1"], (1, 0))[:, :, None]
    wca2 = jnp.transpose(p["wca2"], (1, 0))[:, :, None]
    wsp = jnp.transpose(p["wsp"], (1, 0))[None, :, :]

    residual = bn(_torch_conv1d(x, wsc, p["bsc"].reshape(-1), 0),
                  p["bnsc_scale"].reshape(-1), p["bnsc_shift"].reshape(-1))
    out = spike(bn(_torch_conv1d(x, w1, p["b1"].reshape(-1), 1),
                   p["bn1_scale"].reshape(-1), p["bn1_shift"].reshape(-1)))
    out = spike(bn(_torch_conv1d(out, w2, p["b2"].reshape(-1), 1),
                   p["bn2_scale"].reshape(-1), p["bn2_shift"].reshape(-1)))

    avg = jnp.mean(out, axis=2, keepdims=True)                               # (N, C, 1)
    h = jax.nn.relu(_torch_conv1d(avg, wca1, p["bca1"].reshape(-1), 0))
    ca = jax.nn.sigmoid(_torch_conv1d(h, wca2, p["bca2"].reshape(-1), 0))    # (N, C, 1)
    sp = jax.nn.sigmoid(_torch_conv1d(out, wsp, p["bsp"].reshape(-1), 3))    # (N, 1, L)

    out_att = CHANNEL_GATE * (out * ca) + SPATIAL_GATE * (out * sp)
    return out_att + residual


if __name__ == "__main__":
    key = jax.random.PRNGKey(0)
    kx, kp = jax.random.split(key)
    x = jax.random.normal(kx, (N, C_IN, L), jnp.float32)   # PyTorch NCL layout
    params = init_params(kp)
    packed = pack_params(params)

    out = conv_sab(x, packed)
    out = jax.block_until_ready(out)
    assert out.shape == (N, C_OUT, L)
    assert bool(jnp.all(jnp.isfinite(out)))

    ref = reference_forward(x, params)
    # Attention-path and residual matmuls run at default (bf16-input) MXU precision and the
    # sigmoids use the approximate EUP reciprocal, so tolerance is 1e-2.  The spike-feeding
    # convs stay effectively exact (HIGHEST conv1, hi/lo-split conv2), so any structural
    # error (spike flip, wrong tap/layout) shows up as an O(0.1)+ mismatch and is caught.
    np.testing.assert_allclose(np.asarray(out), np.asarray(ref), atol=1e-2, rtol=1e-2)
    print("KERNEL_OK")
</pallas_src>

<mosaic_0001>
module attributes {stable_mosaic.version = 11 : i64} {
  func.func @conv_sab_kernel(%arg0: memref<32x16xf32, #tpu.memory_space<vmem>>, %arg1: memref<424x32xf32, #tpu.memory_space<vmem>>, %arg2: memref<32x32xf32, #tpu.memory_space<vmem>>) attributes {dimension_semantics = [], scalar_prefetch = 0 : i64, scratch_operands = 0 : i64, tpu.core_type = #tpu.core_type<tc>} {
    %c0 = arith.constant 0 : index
    %c0_0 = arith.constant 0 : index
    %0 = vector.load %arg0[%c0, %c0_0] : memref<32x16xf32, #tpu.memory_space<vmem>>, vector<32x16xf32>
    %c0_1 = arith.constant 0 : index
    %c0_2 = arith.constant 0 : index
    %1 = vector.load %arg1[%c0_1, %c0_2] : memref<424x32xf32, #tpu.memory_space<vmem>>, vector<48x32xf32>
    %c48 = arith.constant 48 : index
    %c0_3 = arith.constant 0 : index
    %2 = vector.load %arg1[%c48, %c0_3] : memref<424x32xf32, #tpu.memory_space<vmem>>, vector<96x32xf32>
    %c144 = arith.constant 144 : index
    %c0_4 = arith.constant 0 : index
    %3 = vector.load %arg1[%c144, %c0_4] : memref<424x32xf32, #tpu.memory_space<vmem>>, vector<96x32xf32>
    %c240 = arith.constant 240 : index
    %c0_5 = arith.constant 0 : index
    %4 = vector.load %arg1[%c240, %c0_5] : memref<424x32xf32, #tpu.memory_space<vmem>>, vector<16x32xf32>
    %c256 = arith.constant 256 : index
    %c0_6 = arith.constant 0 : index
    %5 = vector.load %arg1[%c256, %c0_6] : memref<424x32xf32, #tpu.memory_space<vmem>>, vector<32x32xf32>
    %c288 = arith.constant 288 : index
    %c0_7 = arith.constant 0 : index
    %6 = vector.load %arg1[%c288, %c0_7] : memref<424x32xf32, #tpu.memory_space<vmem>>, vector<32x32xf32>
    %c320 = arith.constant 320 : index
    %c0_8 = arith.constant 0 : index
    %7 = vector.load %arg1[%c320, %c0_8] : memref<424x32xf32, #tpu.memory_space<vmem>>, vector<32x32xf32>
    %c352 = arith.constant 352 : index
    %c0_9 = arith.constant 0 : index
    %8 = vector.load %arg1[%c352, %c0_9] : memref<424x32xf32, #tpu.memory_space<vmem>>, vector<32x32xf32>
    %c384 = arith.constant 384 : index
    %c0_10 = arith.constant 0 : index
    %9 = vector.load %arg1[%c384, %c0_10] : memref<424x32xf32, #tpu.memory_space<vmem>>, vector<32x32xf32>
    %c416 = arith.constant 416 : index
    %c0_11 = arith.constant 0 : index
    %10 = vector.load %arg1[%c416, %c0_11] : memref<424x32xf32, #tpu.memory_space<vmem>>, vector<8x32xf32>
    %11 = vector.extract_strided_slice %10 {offsets = [0, 0], sizes = [1, 32], strides = [1, 1]} : vector<8x32xf32> to vector<1x32xf32>
    %12 = vector.extract_strided_slice %10 {offsets = [1, 0], sizes = [1, 32], strides = [1, 1]} : vector<8x32xf32> to vector<1x32xf32>
    %13 = vector.extract_strided_slice %10 {offsets = [2, 0], sizes = [1, 32], strides = [1, 1]} : vector<8x32xf32> to vector<1x32xf32>
    %14 = vector.extract_strided_slice %10 {offsets = [3, 0], sizes = [1, 32], strides = [1, 1]} : vector<8x32xf32> to vector<1x32xf32>
    %15 = vector.extract_strided_slice %10 {offsets = [4, 0], sizes = [1, 32], strides = [1, 1]} : vector<8x32xf32> to vector<1x32xf32>
    %16 = vector.extract_strided_slice %10 {offsets = [5, 0], sizes = [1, 32], strides = [1, 1]} : vector<8x32xf32> to vector<1x32xf32>
    %17 = tpu.iota {dimensions = array<i32: 0>} : vector<32x1xi32>
    %c15_i32 = arith.constant 15 : i32
    %18 = vector.broadcast %c15_i32 : i32 to vector<32x1xi32>
    %19 = arith.andi %17, %18 : vector<32x1xi32>
    %c3_i32 = arith.constant 3 : i32
    %20 = vector.broadcast %c3_i32 : i32 to vector<32x1xi32>
    %21 = arith.cmpi sge, %19, %20 : vector<32x1xi32>
    %c2_i32 = arith.constant 2 : i32
    %22 = vector.broadcast %c2_i32 : i32 to vector<32x1xi32>
    %23 = arith.cmpi sge, %19, %22 : vector<32x1xi32>
    %c1_i32 = arith.constant 1 : i32
    %24 = vector.broadcast %c1_i32 : i32 to vector<32x1xi32>
    %25 = arith.cmpi sge, %19, %24 : vector<32x1xi32>
    %c15_i32_12 = arith.constant 15 : i32
    %26 = vector.broadcast %c15_i32_12 : i32 to vector<32x1xi32>
    %27 = arith.cmpi slt, %19, %26 : vector<32x1xi32>
    %c14_i32 = arith.constant 14 : i32
    %28 = vector.broadcast %c14_i32 : i32 to vector<32x1xi32>
    %29 = arith.cmpi slt, %19, %28 : vector<32x1xi32>
    %c13_i32 = arith.constant 13 : i32
    %30 = vector.broadcast %c13_i32 : i32 to vector<32x1xi32>
    %31 = arith.cmpi slt, %19, %30 : vector<32x1xi32>
    %32 = tpu.iota {dimensions = array<i32: 1>} : vector<1x32xi32>
    %cst = arith.constant 0.000000e+00 : f32
    %33 = vector.broadcast %cst : f32 to vector<1x16xf32>
    %34 = vector.extract_strided_slice %0 {offsets = [0, 0], sizes = [31, 16], strides = [1, 1]} : vector<32x16xf32> to vector<31x16xf32>
    %35 = tpu.concatenate %33, %34 in 0 : vector<1x16xf32>, vector<31x16xf32> -> vector<32x16xf32>
    %cst_13 = arith.constant 0.000000e+00 : f32
    %36 = vector.shape_cast %25 : vector<32x1xi1> to vector<32x1xi1>
    %37 = vector.broadcast %36 : vector<32x1xi1> to vector<32x16xi1>
    %38 = vector.broadcast %cst_13 : f32 to vector<32x16xf32>
    %39 = arith.select %37, %35, %38 : vector<32x16xi1>, vector<32x16xf32>
    %cst_14 = arith.constant 0.000000e+00 : f32
    %40 = vector.broadcast %cst_14 : f32 to vector<1x16xf32>
    %41 = vector.extract_strided_slice %0 {offsets = [1, 0], sizes = [31, 16], strides = [1, 1]} : vector<32x16xf32> to vector<31x16xf32>
    %42 = tpu.concatenate %41, %40 in 0 : vector<31x16xf32>, vector<1x16xf32> -> vector<32x16xf32>
    %cst_15 = arith.constant 0.000000e+00 : f32
    %43 = vector.shape_cast %27 : vector<32x1xi1> to vector<32x1xi1>
    %44 = vector.broadcast %43 : vector<32x1xi1> to vector<32x16xi1>
    %45 = vector.broadcast %cst_15 : f32 to vector<32x16xf32>
    %46 = arith.select %44, %42, %45 : vector<32x16xi1>, vector<32x16xf32>
    %47 = tpu.concatenate %39, %0, %46 in 1 : vector<32x16xf32>, vector<32x16xf32>, vector<32x16xf32> -> vector<32x48xf32>
    %cst_16 = arith.constant dense<0.000000e+00> : vector<32x32xf32>
    %48 = tpu.matmul %47, %1, %cst_16 {dimension_numbers = #tpu.dot_dimension_numbers<[1], [0], [0], [1], [0, 0, 1, 1], [], []>, precision = #tpu.contract_precision<fp32>} : vector<32x48xf32>, vector<48x32xf32>, vector<32x32xf32> -> vector<32x32xf32>
    %49 = vector.broadcast %11 : vector<1x32xf32> to vector<32x32xf32>
    %50 = arith.cmpf oge, %48, %49 : vector<32x32xf32>
    %51 = arith.extui %50 : vector<32x32xi1> to vector<32x32xi32>
    %52 = arith.sitofp %51 : vector<32x32xi32> to vector<32x32xf32>
    %cst_17 = arith.constant 0.000000e+00 : f32
    %53 = vector.broadcast %cst_17 : f32 to vector<1x32xf32>
    %54 = vector.extract_strided_slice %52 {offsets = [0, 0], sizes = [31, 32], strides = [1, 1]} : vector<32x32xf32> to vector<31x32xf32>
    %55 = tpu.concatenate %53, %54 in 0 : vector<1x32xf32>, vector<31x32xf32> -> vector<32x32xf32>
    %cst_18 = arith.constant 0.000000e+00 : f32
    %56 = vector.shape_cast %25 : vector<32x1xi1> to vector<32x1xi1>
    %57 = vector.broadcast %56 : vector<32x1xi1> to vector<32x32xi1>
    %58 = vector.broadcast %cst_18 : f32 to vector<32x32xf32>
    %59 = arith.select %57, %55, %58 : vector<32x32xi1>, vector<32x32xf32>
    %cst_19 = arith.constant 0.000000e+00 : f32
    %60 = vector.broadcast %cst_19 : f32 to vector<1x32xf32>
    %61 = vector.extract_strided_slice %52 {offsets = [1, 0], sizes = [31, 32], strides = [1, 1]} : vector<32x32xf32> to vector<31x32xf32>
    %62 = tpu.concatenate %61, %60 in 0 : vector<31x32xf32>, vector<1x32xf32> -> vector<32x32xf32>
    %cst_20 = arith.constant 0.000000e+00 : f32
    %63 = vector.shape_cast %27 : vector<32x1xi1> to vector<32x1xi1>
    %64 = vector.broadcast %63 : vector<32x1xi1> to vector<32x32xi1>
    %65 = vector.broadcast %cst_20 : f32 to vector<32x32xf32>
    %66 = arith.select %64, %62, %65 : vector<32x32xi1>, vector<32x32xf32>
    %67 = tpu.concatenate %59, %52, %66 in 1 : vector<32x32xf32>, vector<32x32xf32>, vector<32x32xf32> -> vector<32x96xf32>
    %cst_21 = arith.constant dense<0.000000e+00> : vector<32x32xf32>
    %68 = tpu.matmul %67, %2, %cst_21 {dimension_numbers = #tpu.dot_dimension_numbers<[1], [0], [0], [1], [0, 0, 1, 1], [], []>} : vector<32x96xf32>, vector<96x32xf32>, vector<32x32xf32> -> vector<32x32xf32>
    %cst_22 = arith.constant dense<0.000000e+00> : vector<32x32xf32>
    %69 = tpu.matmul %67, %3, %cst_22 {dimension_numbers = #tpu.dot_dimension_numbers<[1], [0], [0], [1], [0, 0, 1, 1], [], []>} : vector<32x96xf32>, vector<96x32xf32>, vector<32x32xf32> -> vector<32x32xf32>
    %70 = arith.addf %68, %69 : vector<32x32xf32>
    %71 = vector.broadcast %12 : vector<1x32xf32> to vector<32x32xf32>
    %72 = arith.cmpf oge, %70, %71 : vector<32x32xf32>
    %73 = arith.extui %72 : vector<32x32xi1> to vector<32x32xi32>
    %74 = arith.sitofp %73 : vector<32x32xi32> to vector<32x32xf32>
    %cst_23 = arith.constant dense<0.000000e+00> : vector<32x32xf32>
    %75 = tpu.matmul %0, %4, %cst_23 {dimension_numbers = #tpu.dot_dimension_numbers<[1], [0], [0], [1], [0, 0, 1, 1], [], []>} : vector<32x16xf32>, vector<16x32xf32>, vector<32x32xf32> -> vector<32x32xf32>
    %76 = vector.broadcast %13 : vector<1x32xf32> to vector<32x32xf32>
    %77 = arith.addf %75, %76 : vector<32x32xf32>
    %cst_24 = arith.constant dense<0.000000e+00> : vector<32x32xf32>
    %78 = tpu.matmul %8, %74, %cst_24 {dimension_numbers = #tpu.dot_dimension_numbers<[1], [0], [0], [1], [0, 0, 1, 1], [], []>} : vector<32x32xf32>, vector<32x32xf32>, vector<32x32xf32> -> vector<32x32xf32>
    %cst_25 = arith.constant dense<0.000000e+00> : vector<32x32xf32>
    %79 = tpu.matmul %78, %5, %cst_25 {dimension_numbers = #tpu.dot_dimension_numbers<[1], [0], [0], [1], [0, 0, 1, 1], [], []>} : vector<32x32xf32>, vector<32x32xf32>, vector<32x32xf32> -> vector<32x32xf32>
    %80 = vector.broadcast %14 : vector<1x32xf32> to vector<32x32xf32>
    %81 = arith.addf %79, %80 : vector<32x32xf32>
    %cst_26 = arith.constant 0.000000e+00 : f32
    %82 = vector.broadcast %cst_26 : f32 to vector<32x32xf32>
    %83 = arith.maximumf %81, %82 : vector<32x32xf32>
    %cst_27 = arith.constant dense<0.000000e+00> : vector<32x32xf32>
    %84 = tpu.matmul %83, %6, %cst_27 {dimension_numbers = #tpu.dot_dimension_numbers<[1], [0], [0], [1], [0, 0, 1, 1], [], []>} : vector<32x32xf32>, vector<32x32xf32>, vector<32x32xf32> -> vector<32x32xf32>
    %85 = vector.broadcast %15 : vector<1x32xf32> to vector<32x32xf32>
    %86 = arith.addf %84, %85 : vector<32x32xf32>
    %cst_28 = arith.constant 0.000000e+00 : f32
    %87 = vector.broadcast %cst_28 : f32 to vector<32x32xf32>
    %88 = arith.subf %87, %86 : vector<32x32xf32>
    %89 = math.exp %88 : vector<32x32xf32>
    %cst_29 = arith.constant 1.000000e+00 : f32
    %90 = vector.broadcast %cst_29 : f32 to vector<32x32xf32>
    %91 = arith.addf %90, %89 : vector<32x32xf32>
    %92 = tpu.reciprocal %91 {approx = true} : vector<32x32xf32> -> vector<32x32xf32>
    %cst_30 = arith.constant dense<0.000000e+00> : vector<32x32xf32>
    %93 = tpu.matmul %9, %92, %cst_30 {dimension_numbers = #tpu.dot_dimension_numbers<[1], [0], [0], [1], [0, 0, 1, 1], [], []>} : vector<32x32xf32>, vector<32x32xf32>, vector<32x32xf32> -> vector<32x32xf32>
    %cst_31 = arith.constant dense<0.000000e+00> : vector<32x32xf32>
    %94 = tpu.matmul %74, %7, %cst_31 {dimension_numbers = #tpu.dot_dimension_numbers<[1], [0], [0], [1], [0, 0, 1, 1], [], []>} : vector<32x32xf32>, vector<32x32xf32>, vector<32x32xf32> -> vector<32x32xf32>
    %c3_i32_32 = arith.constant 3 : i32
    %95 = vector.broadcast %c3_i32_32 : i32 to vector<1x32xi32>
    %96 = arith.cmpi eq, %32, %95 : vector<1x32xi32>
    %cst_33 = arith.constant 0.000000e+00 : f32
    %97 = vector.shape_cast %96 : vector<1x32xi1> to vector<1x32xi1>
    %98 = vector.broadcast %97 : vector<1x32xi1> to vector<32x32xi1>
    %99 = vector.broadcast %cst_33 : f32 to vector<32x32xf32>
    %100 = arith.select %98, %94, %99 : vector<32x32xi1>, vector<32x32xf32>
    %c0_i32 = arith.constant 0 : i32
    %101 = vector.broadcast %c0_i32 : i32 to vector<1x32xi32>
    %102 = arith.cmpi eq, %32, %101 : vector<1x32xi32>
    %cst_34 = arith.constant 0.000000e+00 : f32
    %103 = vector.broadcast %cst_34 : f32 to vector<3x32xf32>
    %104 = vector.extract_strided_slice %94 {offsets = [0, 0], sizes = [29, 32], strides = [1, 1]} : vector<32x32xf32> to vector<29x32xf32>
    %105 = tpu.concatenate %103, %104 in 0 : vector<3x32xf32>, vector<29x32xf32> -> vector<32x32xf32>
    %cst_35 = arith.constant 0.000000e+00 : f32
    %106 = vector.shape_cast %21 : vector<32x1xi1> to vector<32x1xi1>
    %107 = vector.broadcast %106 : vector<32x1xi1> to vector<32x32xi1>
    %108 = vector.broadcast %cst_35 : f32 to vector<32x32xf32>
    %109 = arith.select %107, %105, %108 : vector<32x32xi1>, vector<32x32xf32>
    %cst_36 = arith.constant 0.000000e+00 : f32
    %110 = vector.shape_cast %102 : vector<1x32xi1> to vector<1x32xi1>
    %111 = vector.broadcast %110 : vector<1x32xi1> to vector<32x32xi1>
    %112 = vector.broadcast %cst_36 : f32 to vector<32x32xf32>
    %113 = arith.select %111, %109, %112 : vector<32x32xi1>, vector<32x32xf32>
    %114 = arith.addf %100, %113 : vector<32x32xf32>
    %c1_i32_37 = arith.constant 1 : i32
    %115 = vector.broadcast %c1_i32_37 : i32 to vector<1x32xi32>
    %116 = arith.cmpi eq, %32, %115 : vector<1x32xi32>
    %cst_38 = arith.constant 0.000000e+00 : f32
    %117 = vector.broadcast %cst_38 : f32 to vector<2x32xf32>
    %118 = vector.extract_strided_slice %94 {offsets = [0, 0], sizes = [30, 32], strides = [1, 1]} : vector<32x32xf32> to vector<30x32xf32>
    %119 = tpu.concatenate %117, %118 in 0 : vector<2x32xf32>, vector<30x32xf32> -> vector<32x32xf32>
    %cst_39 = arith.constant 0.000000e+00 : f32
    %120 = vector.shape_cast %23 : vector<32x1xi1> to vector<32x1xi1>
    %121 = vector.broadcast %120 : vector<32x1xi1> to vector<32x32xi1>
    %122 = vector.broadcast %cst_39 : f32 to vector<32x32xf32>
    %123 = arith.select %121, %119, %122 : vector<32x32xi1>, vector<32x32xf32>
    %cst_40 = arith.constant 0.000000e+00 : f32
    %124 = vector.shape_cast %116 : vector<1x32xi1> to vector<1x32xi1>
    %125 = vector.broadcast %124 : vector<1x32xi1> to vector<32x32xi1>
    %126 = vector.broadcast %cst_40 : f32 to vector<32x32xf32>
    %127 = arith.select %125, %123, %126 : vector<32x32xi1>, vector<32x32xf32>
    %128 = arith.addf %114, %127 : vector<32x32xf32>
    %c2_i32_41 = arith.constant 2 : i32
    %129 = vector.broadcast %c2_i32_41 : i32 to vector<1x32xi32>
    %130 = arith.cmpi eq, %32, %129 : vector<1x32xi32>
    %cst_42 = arith.constant 0.000000e+00 : f32
    %131 = vector.broadcast %cst_42 : f32 to vector<1x32xf32>
    %132 = vector.extract_strided_slice %94 {offsets = [0, 0], sizes = [31, 32], strides = [1, 1]} : vector<32x32xf32> to vector<31x32xf32>
    %133 = tpu.concatenate %131, %132 in 0 : vector<1x32xf32>, vector<31x32xf32> -> vector<32x32xf32>
    %cst_43 = arith.constant 0.000000e+00 : f32
    %134 = vector.shape_cast %25 : vector<32x1xi1> to vector<32x1xi1>
    %135 = vector.broadcast %134 : vector<32x1xi1> to vector<32x32xi1>
    %136 = vector.broadcast %cst_43 : f32 to vector<32x32xf32>
    %137 = arith.select %135, %133, %136 : vector<32x32xi1>, vector<32x32xf32>
    %cst_44 = arith.constant 0.000000e+00 : f32
    %138 = vector.shape_cast %130 : vector<1x32xi1> to vector<1x32xi1>
    %139 = vector.broadcast %138 : vector<1x32xi1> to vector<32x32xi1>
    %140 = vector.broadcast %cst_44 : f32 to vector<32x32xf32>
    %141 = arith.select %139, %137, %140 : vector<32x32xi1>, vector<32x32xf32>
    %142 = arith.addf %128, %141 : vector<32x32xf32>
    %c4_i32 = arith.constant 4 : i32
    %143 = vector.broadcast %c4_i32 : i32 to vector<1x32xi32>
    %144 = arith.cmpi eq, %32, %143 : vector<1x32xi32>
    %cst_45 = arith.constant 0.000000e+00 : f32
    %145 = vector.broadcast %cst_45 : f32 to vector<1x32xf32>
    %146 = vector.extract_strided_slice %94 {offsets = [1, 0], sizes = [31, 32], strides = [1, 1]} : vector<32x32xf32> to vector<31x32xf32>
    %147 = tpu.concatenate %146, %145 in 0 : vector<31x32xf32>, vector<1x32xf32> -> vector<32x32xf32>
    %cst_46 = arith.constant 0.000000e+00 : f32
    %148 = vector.shape_cast %27 : vector<32x1xi1> to vector<32x1xi1>
    %149 = vector.broadcast %148 : vector<32x1xi1> to vector<32x32xi1>
    %150 = vector.broadcast %cst_46 : f32 to vector<32x32xf32>
    %151 = arith.select %149, %147, %150 : vector<32x32xi1>, vector<32x32xf32>
    %cst_47 = arith.constant 0.000000e+00 : f32
    %152 = vector.shape_cast %144 : vector<1x32xi1> to vector<1x32xi1>
    %153 = vector.broadcast %152 : vector<1x32xi1> to vector<32x32xi1>
    %154 = vector.broadcast %cst_47 : f32 to vector<32x32xf32>
    %155 = arith.select %153, %151, %154 : vector<32x32xi1>, vector<32x32xf32>
    %156 = arith.addf %142, %155 : vector<32x32xf32>
    %c5_i32 = arith.constant 5 : i32
    %157 = vector.broadcast %c5_i32 : i32 to vector<1x32xi32>
    %158 = arith.cmpi eq, %32, %157 : vector<1x32xi32>
    %cst_48 = arith.constant 0.000000e+00 : f32
    %159 = vector.broadcast %cst_48 : f32 to vector<2x32xf32>
    %160 = vector.extract_strided_slice %94 {offsets = [2, 0], sizes = [30, 32], strides = [1, 1]} : vector<32x32xf32> to vector<30x32xf32>
    %161 = tpu.concatenate %160, %159 in 0 : vector<30x32xf32>, vector<2x32xf32> -> vector<32x32xf32>
    %cst_49 = arith.constant 0.000000e+00 : f32
    %162 = vector.shape_cast %29 : vector<32x1xi1> to vector<32x1xi1>
    %163 = vector.broadcast %162 : vector<32x1xi1> to vector<32x32xi1>
    %164 = vector.broadcast %cst_49 : f32 to vector<32x32xf32>
    %165 = arith.select %163, %161, %164 : vector<32x32xi1>, vector<32x32xf32>
    %cst_50 = arith.constant 0.000000e+00 : f32
    %166 = vector.shape_cast %158 : vector<1x32xi1> to vector<1x32xi1>
    %167 = vector.broadcast %166 : vector<1x32xi1> to vector<32x32xi1>
    %168 = vector.broadcast %cst_50 : f32 to vector<32x32xf32>
    %169 = arith.select %167, %165, %168 : vector<32x32xi1>, vector<32x32xf32>
    %170 = arith.addf %156, %169 : vector<32x32xf32>
    %c6_i32 = arith.constant 6 : i32
    %171 = vector.broadcast %c6_i32 : i32 to vector<1x32xi32>
    %172 = arith.cmpi eq, %32, %171 : vector<1x32xi32>
    %cst_51 = arith.constant 0.000000e+00 : f32
    %173 = vector.broadcast %cst_51 : f32 to vector<3x32xf32>
    %174 = vector.extract_strided_slice %94 {offsets = [3, 0], sizes = [29, 32], strides = [1, 1]} : vector<32x32xf32> to vector<29x32xf32>
    %175 = tpu.concatenate %174, %173 in 0 : vector<29x32xf32>, vector<3x32xf32> -> vector<32x32xf32>
    %cst_52 = arith.constant 0.000000e+00 : f32
    %176 = vector.shape_cast %31 : vector<32x1xi1> to vector<32x1xi1>
    %177 = vector.broadcast %176 : vector<32x1xi1> to vector<32x32xi1>
    %178 = vector.broadcast %cst_52 : f32 to vector<32x32xf32>
    %179 = arith.select %177, %175, %178 : vector<32x32xi1>, vector<32x32xf32>
    %cst_53 = arith.constant 0.000000e+00 : f32
    %180 = vector.shape_cast %172 : vector<1x32xi1> to vector<1x32xi1>
    %181 = vector.broadcast %180 : vector<1x32xi1> to vector<32x32xi1>
    %182 = vector.broadcast %cst_53 : f32 to vector<32x32xf32>
    %183 = arith.select %181, %179, %182 : vector<32x32xi1>, vector<32x32xf32>
    %184 = arith.addf %170, %183 : vector<32x32xf32>
    %cst_54 = arith.constant 1.000000e+00 : f32
    %185 = vector.broadcast %cst_54 : f32 to vector<32x32xf32>
    %cst_55 = arith.constant dense<0.000000e+00> : vector<32x32xf32>
    %186 = tpu.matmul %184, %185, %cst_55 {dimension_numbers = #tpu.dot_dimension_numbers<[1], [0], [0], [1], [0, 0, 1, 1], [], []>} : vector<32x32xf32>, vector<32x32xf32>, vector<32x32xf32> -> vector<32x32xf32>
    %187 = vector.broadcast %16 : vector<1x32xf32> to vector<32x32xf32>
    %188 = arith.addf %186, %187 : vector<32x32xf32>
    %cst_56 = arith.constant 0.000000e+00 : f32
    %189 = vector.broadcast %cst_56 : f32 to vector<32x32xf32>
    %190 = arith.subf %189, %188 : vector<32x32xf32>
    %191 = math.exp %190 : vector<32x32xf32>
    %cst_57 = arith.constant 1.000000e+00 : f32
    %192 = vector.broadcast %cst_57 : f32 to vector<32x32xf32>
    %193 = arith.addf %192, %191 : vector<32x32xf32>
    %194 = tpu.reciprocal %193 {approx = true} : vector<32x32xf32> -> vector<32x32xf32>
    %cst_58 = arith.constant 7.500000e-01 : f32
    %195 = vector.broadcast %cst_58 : f32 to vector<32x32xf32>
    %196 = arith.mulf %195, %93 : vector<32x32xf32>
    %cst_59 = arith.constant 5.000000e-01 : f32
    %197 = vector.broadcast %cst_59 : f32 to vector<32x32xf32>
    %198 = arith.mulf %197, %194 : vector<32x32xf32>
    %199 = arith.addf %196, %198 : vector<32x32xf32>
    %200 = arith.mulf %74, %199 : vector<32x32xf32>
    %201 = arith.addf %200, %77 : vector<32x32xf32>
    %c0_60 = arith.constant 0 : index
    %c0_61 = arith.constant 0 : index
    %202 = vector.load %arg2[%c0_60, %c0_61] : memref<32x32xf32, #tpu.memory_space<vmem>>, vector<32x32xf32>
    tpu.vector_store %arg2[%c0_60, %c0_61], %201 {strides = array<i32>} : memref<32x32xf32, #tpu.memory_space<vmem>>, vector<32x32xf32>,
    return
  }
}

</mosaic_0001>

<bundles_post_ra>
// kernel: conv_sab.1
= control target key start
LH: loop header
LB: loop body
LE: loop exit
PB: predicated region body
PF: predicated region fallthrough
CT: control target
= control target key end

     0   :  { %vm133_vm0 = vcmask 1046528   ;;  %v69_v3 = vlaneseq  ;;  %s2853_s15 = smov 16   ;;  %s2854_s18 = smov 32   ;;  %s3583_s0 = inlined_call_operand.vmem [shape: f32[32,16], index: 0, kind: input, shape index: {}]   ;;  %s3584_s1 = inlined_call_operand.vmem [shape: f32[424,32], index: 1, kind: input, shape index: {}]   ;;  %s3585_s2 = inlined_call_operand.hbm [shape: f32[32,32], index: 2, kind: output, shape index: {}]  }
   0x1   :  { %v2879_v0 = vld [vmem:[%s3583_s0] sm:$0xff]  ;;  %v2884_v1 = vld [vmem:[%s3583_s0 + $0x8] sm:$0xff]  ;;  %v2889_v2 = vld [vmem:[%s3583_s0 + $0x10] sm:$0xff] }
   0x2   :  { %158 = vrot.lane.b32.xlu0 %v2879_v0, %s2853_s15  ;;  %v134_v4 = vrot.slane %v2879_v0, 1  ;;  %v135_v5 = vrot.slane %v2884_v1, 1  ;;  %v2896_v6 = vshrl.u32 %v69_v3, 7  ;;  %v137_v7 = vrot.slane %v2889_v2, 1  ;;  %v2903_v9 = vld [vmem:[%s3583_s0 + $0x18] sm:$0xff] }
   0x4   :  { %v136_v8 = vsel %vm133_vm0, %v134_v4, %v135_v5  ;;  %v71_v10 = vadd.s32 8, %v2896_v6  ;;  %v73_v11 = vadd.s32 24, %v2896_v6 }
   0x5   :  { %174 = vrot.lane.b32.xlu1 %v136_v8, %s2854_s18 }
   0x6   :  { %7 = vsyncpa [#allocation3], 0  ;;  %160 = vrot.lane.b32.xlu0 %v2884_v1, %s2853_s15  ;;  %v16_v12 = vld [vmem:[%s3584_s1] sm:$0xff]  ;;  %v2913_v13 = vand.u32 15, %v71_v10  ;;  %v138_v14 = vsel %vm133_vm0, %v135_v5, %v137_v7  ;;  %v139_v15 = vrot.slane %v2903_v9, 1  ;;  %v17_v16 = vld [vmem:[%s3584_s1 + $0x8] sm:$0xff] }
   0x7   :  { %v18_v17 = vld [vmem:[%s3584_s1 + $0x10] sm:$0xff]  ;;  %v19_v18 = vld [vmem:[%s3584_s1 + $0x18] sm:$0xff]  ;;  %v2927_v19 = vand.u32 15, %v73_v11  ;;  %v210_v20 = vand.u32 4294901760, %v16_v12  ;;  %v20_v22 = vld [vmem:[%s3584_s1 + $0x20] sm:$0xff]  ;;  %v213_v24 = vand.u32 4294901760, %v17_v16 }
   0x8   :  { %vm91_vm1 = vcmp.lt.s32.totalorder %v2913_v13, 15  ;;  %v140_v23 = vsel %vm133_vm0, %v137_v7, %v139_v15  ;;  %v216_v25 = vand.u32 4294901760, %v18_v17  ;;  %v219_v26 = vand.u32 4294901760, %v19_v18  ;;  %v21_v27 = vld [vmem:[%s3584_s1 + $0x28] sm:$0xff]  ;;  %s2856_s4 = smov 64  }
   0x9   :  { %v155_v21 = vsel %vm91_vm1, %v138_v14, 0.0  ;;  %v145_v28 = vsel %vm133_vm0, %v139_v15, 0.0  ;;  %vm3587_vm2 = vcmp.lt.s32.totalorder %v2927_v19, 15  ;;  %v2943_v29 = vpack.c.bf16 %v213_v24, %v210_v20 }
   0xa   :  { %162 = vrot.lane.b32.xlu0 %v2889_v2, %s2853_s15  ;;  %176 = vrot.lane.b32.xlu1 %v155_v21, %s2854_s18  ;;  %v2945_v30 = vpack.c.bf16 %v219_v26, %v216_v25  ;;  %v222_v31 = vand.u32 4294901760, %v20_v22  ;;  %v225_v32 = vand.u32 4294901760, %v21_v27  ;;  %v322_v33 = vsub.f32 %v16_v12, %v210_v20 }
   0xb   :  { %v329_v34 = vsub.f32 %v17_v16, %v213_v24  ;;  %2578 = vmatprep.subr.bf16.mxu0 %v2943_v29  ;;  %v336_v35 = vsub.f32 %v18_v17, %v216_v25  ;;  %v343_v36 = vsub.f32 %v19_v18, %v219_v26  ;;  %v157_v38 = vsel %vm3587_vm2, %v145_v28, 0.0 }
   0xc   :  { %v350_v37 = vsub.f32 %v20_v22, %v222_v31  ;;  %2580 = vmatpush3.bf16.msra.mxu0 %v2943_v29  ;;  %v323_v39 = vand.u32 4294901760, %v322_v33  ;;  %v357_v41 = vsub.f32 %v21_v27, %v225_v32  ;;  %v2955_v42 = vpack.c.bf16 %v225_v32, %v222_v31 }
   0xd   :  { %v330_v40 = vand.u32 4294901760, %v329_v34  ;;  %2582 = vmatprep.subr.bf16.mxu0 %v2945_v30  ;;  %v337_v43 = vand.u32 4294901760, %v336_v35  ;;  %v344_v44 = vand.u32 4294901760, %v343_v36  ;;  %v2958_v52 = vpack.c.bf16 %v329_v34, %v322_v33 }
   0xe   :  { %178 = vrot.lane.b32.xlu0 %v140_v23, %s2854_s18  ;;  %164 = vrot.lane.b32.xlu1 %v2903_v9, %s2853_s15  ;;  %v351_v45 = vand.u32 4294901760, %v350_v37  ;;  %v324_v46 = vsub.f32 %v322_v33, %v323_v39  ;;  %v358_v48 = vand.u32 4294901760, %v357_v41  ;;  %v2966_v62 = vpack.c.bf16 %v343_v36, %v336_v35 }
   0xf   :  { %v331_v47 = vsub.f32 %v329_v34, %v330_v40  ;;  %v338_v49 = vsub.f32 %v336_v35, %v337_v43  ;;  %v345_v50 = vsub.f32 %v343_v36, %v344_v44  ;;  %v2972_v4 = vpack.c.bf16 %v357_v41, %v350_v37 }
  0x10   :  { %v352_v51 = vsub.f32 %v350_v37, %v351_v45  ;;  %2584 = vmatpush3.bf16.msra.mxu0 %v2945_v30  ;;  %v325_v53 = vand.u32 4294901760, %v324_v46  ;;  %v359_v55 = vsub.f32 %v357_v41, %v358_v48  ;;  %v2974_v5 = vpack.c.bf16 %v330_v40, %v323_v39 }
  0x11   :  { %v332_v54 = vand.u32 4294901760, %v331_v47  ;;  %2586 = vmatprep.subr.bf16.mxu0 %v2955_v42  ;;  %v339_v56 = vand.u32 4294901760, %v338_v49  ;;  %v346_v57 = vand.u32 4294901760, %v345_v50  ;;  %v2976_v7 = vpack.c.bf16 %v344_v44, %v337_v43 }
  0x12   :  { %180 = vrot.lane.b32.xlu1 %v157_v38, %s2854_s18  ;;  %v353_v58 = vand.u32 4294901760, %v352_v51  ;;  %v360_v60 = vand.u32 4294901760, %v359_v55  ;;  %v2978_v8 = vpack.c.bf16 %v358_v48, %v351_v45  ;;  %v2981_v10 = vand.u32 15, %v2896_v6 }
  0x13   :  { %v2962_v59 = vpack.c.bf16 %v332_v54, %v325_v53  ;;  %v2964_v61 = vpack.c.bf16 %v346_v57, %v339_v56  ;;  %v109_v11 = vrot.slane %v2879_v0, 7  ;;  %vm108_vm3 = vcmask 1040384  }
  0x14   :  { %2588 = vmatpush3.bf16.msra.mxu0 %v2955_v42  ;;  %v2969_v63 = vpack.c.bf16 %v360_v60, %v353_v58  ;;  %vm86_vm4 = vcmp.ge.s32.totalorder %v2981_v10, 1  ;;  %v72_v14 = vadd.s32 16, %v2896_v6  ;;  %vm186_vm5 = vcmask 130048  }
  0x15   :  { %2590 = vmatprep.subr.bf16.mxu0 %v2962_v59  ;;  %v120_v12 = vsel %vm108_vm3, 0.0, %v109_v11  ;;  %v112_v16 = vrot.slane %v2889_v2, 7  ;;  %v110_v18 = vrot.slane %v2884_v1, 7  ;;  %vm3586_vm6 = vcmask 261120  }
  0x16   :  { %v129_v15 = vsel %vm86_vm4, %v120_v12, 0.0  ;;  %v2991_v20 = vand.u32 15, %v72_v14  ;;  %vm196_vm7 = vcmask 392192   ;;  %v114_v38 = vrot.slane %v2903_v9, 7 }
  0x17   :  { %v111_v25 = vsel %vm108_vm3, %v109_v11, %v110_v18  ;;  %v113_v26 = vsel %vm108_vm3, %v110_v18, %v112_v16  ;;  %vm933_vm13 = vcmask 523264   ;;  %vm938_vm14 = vcmask 785408  }
  0x18   :  { %vm3588_vm8 = vcmp.ge.s32.totalorder %v2991_v20, 1  ;;  %v115_v49 = vsel %vm108_vm3, %v112_v16, %v114_v38  ;;  %v2855_v38 = vmov 0.0  }
  0x19   :  { %v131_v32 = vsel %vm3588_vm8, %v113_v26, 0.0  ;;  %v3093_v26 = vld [vmem:[%s3584_s1 + $0x1a0] sm:$0xff] }
  0x74   :  { %v159_v17 = vpop.permute.xlu0 %158 }
  0x75   :  { %v187_v21 = vsel %vm186_vm5, %v129_v15, %v159_v17 }
  0x77   :  { %v175_v22 = vpop.permute.xlu1 %174 }
  0x78   :  { %v192_v23 = vsel %vm3586_vm6, %v187_v21, %v175_v22  ;;  %v161_v24 = vpop.permute.xlu0 %160 }
  0x79   :  { %v198_v27 = vsel %vm196_vm7, %v192_v23, 0  ;;  %v188_v31 = vsel %vm186_vm5, %v111_v25, %v161_v24  ;;  %v851_v23 = vsub.s32 0, %v2896_v6  ;;  %v42_v24 = vld [vmem:[%s3584_s1 + $0xd0] sm:$0xff]  ;;  %v43_v25 = vld [vmem:[%s3584_s1 + $0xd8] sm:$0xff] }
  0x7a   :  { %v2999_v28 = vand.u32 4294901760, %v198_v27 }
  0x7c   :  { %v281_v33 = vsub.f32 %v198_v27, %v2999_v28  ;;  %v163_v34 = vpop.permute.xlu0 %162  ;;  %v177_v35 = vpop.permute.xlu1 %176  ;;  %v2665_v27 = vpack.c.bf16 %v43_v25, %v42_v24 }
  0x7d   :  { %v189_v36 = vsel %vm186_vm5, %v131_v32, %v163_v34  ;;  %v193_v37 = vsel %vm3586_vm6, %v188_v31, %v177_v35  ;;  %v44_v31 = vld [vmem:[%s3584_s1 + $0xe0] sm:$0xff]  ;;  %v45_v32 = vld [vmem:[%s3584_s1 + $0xe8] sm:$0xff] }
  0x7e   :  { %v282_v39 = vand.u32 4294901760, %v281_v33  ;;  %v201_v40 = vsel %vm196_vm7, %v193_v37, 0  ;;  %v23_v37 = vld [vmem:[%s3584_s1 + $0x38] sm:$0xff] }
  0x7f   :  { %v3009_v41 = vand.u32 4294901760, %v201_v40 }
  0x80   :  { %v179_v43 = vpop.permute.xlu0 %178  ;;  %v283_v44 = vsub.f32 %v281_v33, %v282_v39  ;;  %v165_v46 = vpop.permute.xlu1 %164 }
  0x81   :  { %v194_v45 = vsel %vm3586_vm6, %v189_v36, %v179_v43  ;;  %v291_v47 = vsub.f32 %v201_v40, %v3009_v41  ;;  %v190_v55 = vsel %vm186_vm5, %v115_v49, %v165_v46  ;;  %v22_v36 = vld [vmem:[%s3584_s1 + $0x30] sm:$0xff] }
  0x82   :  { %v204_v48 = vsel %vm196_vm7, %v194_v45, 0  ;;  %v284_v50 = vand.u32 4294901760, %v283_v44  ;;  %v3109_v40 = vpack.c.bf16 %v23_v37, %v22_v36 }
  0x83   :  { %v3015_v51 = vand.u32 4294901760, %v204_v48  ;;  %v292_v53 = vand.u32 4294901760, %v291_v47 }
  0x84   :  { %2327 = vmatprep.mubr.f32.mxu0 %v284_v50  ;;  %v181_v56 = vpop.permute.xlu1 %180 }
  0x85   :  { %v301_v54 = vsub.f32 %v204_v48, %v3015_v51  ;;  %v195_v57 = vsel %vm3586_vm6, %v190_v55, %v181_v56  ;;  %v293_v58 = vsub.f32 %v291_v47, %v292_v53 }
  0x86   :  { %v207_v60 = vsel %vm196_vm7, %v195_v57, 0 }
  0x87   :  { %v302_v11 = vand.u32 4294901760, %v301_v54  ;;  %v310_v12 = vand.u32 4294901760, %v207_v60  ;;  %v294_v14 = vand.u32 4294901760, %v293_v58 }
  0x89   :  { %v303_v15 = vsub.f32 %v301_v54, %v302_v11  ;;  %v311_v16 = vsub.f32 %v207_v60, %v310_v12  ;;  %2328 = vmatmul.mubr.f32.vlgmr.msra.gmra.mrb[0].mxu0 %v294_v14 }
  0x8a   :  { %2592 = vmatpush3.bf16.msra.mxu0 %v2962_v59 }
  0x8b   :  { %v304_v17 = vand.u32 4294901760, %v303_v15  ;;  %2594 = vmatprep.subr.bf16.mxu0 %v2964_v61  ;;  %v312_v18 = vand.u32 4294901760, %v311_v16 }
  0x8d   :  { %2330 = vmatprep.mubr.f32.mxu0 %v304_v17  ;;  %v313_v21 = vsub.f32 %v311_v16, %v312_v18 }
  0x8e   :  { %2596 = vmatpush3.bf16.msra.mxu0 %v2964_v61 }
  0x8f   :  { %2598 = vmatprep.subr.bf16.mxu0 %v2969_v63  ;;  %v314_v22 = vand.u32 4294901760, %v313_v21 }
  0x91   :  { %2331 = vmatmul.mubr.f32.gmra.mrb[2].mxu0 %v314_v22 }
  0x92   :  { %2600 = vmatpush3.bf16.msra.mxu0 %v2969_v63  ;;  %2345 = vmatprep.mubr.f32.mxu0 %v2999_v28  ;;  %v39_v63 = vld [vmem:[%s3584_s1 + $0xb8] sm:$0xff] }
  0x93   :  { %2602 = vmatprep.subr.bf16.mxu0 %v2958_v52 }
  0x95   :  { %2346 = vmatmul.mubr.f32.vlgmr.msra.gmra.mrb[0].mxu0 %v3009_v41 }
  0x96   :  { %2604 = vmatpush3.bf16.msra.mxu0 %v2958_v52  ;;  %2348 = vmatprep.mubr.f32.mxu0 %v3015_v51  ;;  %v35_v52 = vld [vmem:[%s3584_s1 + $0x98] sm:$0xff] }
  0x97   :  { %2606 = vmatprep.subr.bf16.mxu0 %v2966_v62 }
  0x99   :  { %2349 = vmatmul.mubr.f32.gmra.mrb[2].mxu0 %v310_v12 }
  0x9a   :  { %2608 = vmatpush3.bf16.msra.mxu0 %v2966_v62  ;;  %2363 = vmatprep.mubr.f32.mxu0 %v281_v33  ;;  %v38_v62 = vld [vmem:[%s3584_s1 + $0xb0] sm:$0xff]  ;;  %v2669_v33 = vpack.c.bf16 %v45_v32, %v44_v31 }
  0x9b   :  { %2610 = vmatprep.subr.bf16.mxu0 %v2972_v4 }
  0x9e   :  { %2612 = vmatpush3.bf16.msra.mxu0 %v2972_v4  ;;  %v2657_v4 = vpack.c.bf16 %v39_v63, %v38_v62  ;;  %v24_v62 = vld [vmem:[%s3584_s1 + $0x40] sm:$0xff]  ;;  %v25_v63 = vld [vmem:[%s3584_s1 + $0x48] sm:$0xff] }
  0x9f   :  { %2614 = vmatprep.subr.bf16.mxu0 %v2943_v29  ;;  %v2677_v31 = vpack.c.bf16 %v25_v63, %v24_v62  ;;  %v52_v62 = vld [vmem:[%s3584_s1 + $0x120] sm:$0xff]  ;;  %v53_v63 = vld [vmem:[%s3584_s1 + $0x128] sm:$0xff] }
  0xa1   :  { %2364 = vmatmul.mubr.f32.vlgmr.msra.gmra.mrb[0].mxu0 %v291_v47 }
  0xa2   :  { %2366 = vmatprep.mubr.f32.mxu0 %v301_v54  ;;  %2616 = vmatpush3.bf16.msra.mxu0 %v2943_v29 }
  0xa3   :  { %2618 = vmatprep.subr.bf16.mxu0 %v2945_v30 }
  0xa5   :  { %2367 = vmatmul.mubr.f32.gmra.mrb[2].mxu0 %v311_v16 }
  0xa6   :  { %2620 = vmatpush3.bf16.msra.mxu0 %v2945_v30  ;;  %2381 = vmatprep.mubr.f32.mxu0 %v282_v39 }
  0xa7   :  { %2622 = vmatprep.subr.bf16.mxu0 %v2955_v42 }
  0xaa   :  { %2624 = vmatpush3.bf16.msra.mxu0 %v2955_v42 }
  0xab   :  { %2626 = vmatprep.subr.bf16.mxu0 %v2974_v5 }
  0xad   :  { %2382 = vmatmul.mubr.f32.vlgmr.msra.gmra.mrb[0].mxu0 %v292_v53 }
  0xae   :  { %2384 = vmatprep.mubr.f32.mxu0 %v302_v11  ;;  %2628 = vmatpush3.bf16.msra.mxu0 %v2974_v5  ;;  %v40_v5 = vld [vmem:[%s3584_s1 + $0xc0] sm:$0xff] }
  0xaf   :  { %2630 = vmatprep.subr.bf16.mxu0 %v2976_v7 }
  0xb1   :  { %2385 = vmatmul.mubr.f32.gmra.mrb[2].mxu0 %v312_v18 }
  0xb2   :  { %2632 = vmatpush3.bf16.msra.mxu0 %v2976_v7  ;;  %2399 = vmatprep.mubr.f32.mxu0 %v2999_v28  ;;  %v41_v7 = vld [vmem:[%s3584_s1 + $0xc8] sm:$0xff] }
  0xb3   :  { %2634 = vmatprep.subr.bf16.mxu0 %v2978_v8 }
  0xb6   :  { %2636 = vmatpush3.bf16.msra.mxu0 %v2978_v8  ;;  %v2661_v8 = vpack.c.bf16 %v41_v7, %v40_v5 }
  0xb7   :  { %2638 = vmatprep.subr.bf16.mxu0 %v2943_v29 }
  0xb9   :  { %2400 = vmatmul.mubr.f32.vlgmr.msra.gmra.mrb[0].mxu0 %v3009_v41 }
  0xba   :  { %2402 = vmatprep.mubr.f32.mxu0 %v3015_v51  ;;  %2640 = vmatpush3.bf16.msra.mxu0 %v2943_v29  ;;  %v34_v29 = vld [vmem:[%s3584_s1 + $0x90] sm:$0xff] }
  0xbb   :  { %2642 = vmatprep.subr.bf16.mxu0 %v2945_v30  ;;  %v2649_v59 = vpack.c.bf16 %v35_v52, %v34_v29 }
  0xbd   :  { %2403 = vmatmul.mubr.f32.gmra.mrb[2].mxu0 %v310_v12  ;;  %2650 = vmatprep.subr.bf16.mxu1 %v2649_v59 }
  0xbe   :  { %2644 = vmatpush3.bf16.msra.mxu0 %v2945_v30  ;;  %2417 = vmatprep.mubr.f32.mxu0 %v2999_v28  ;;  %v36_v30 = vld [vmem:[%s3584_s1 + $0xa0] sm:$0xff]  ;;  %v852_v28 = vrot.slane %v3093_v26, %v851_v23 }
  0xbf   :  { %2646 = vmatprep.subr.bf16.mxu0 %v2955_v42  ;;  %2652 = vmatpush3.bf16.msra.mxu1 %v2649_v59 }
  0xc2   :  { %2648 = vmatpush3.bf16.msra.mxu0 %v2955_v42  ;;  %v37_v42 = vld [vmem:[%s3584_s1 + $0xa8] sm:$0xff] }
  0xc3   :  { %v2653_v61 = vpack.c.bf16 %v37_v42, %v36_v30 }
  0xc5   :  { %2418 = vmatmul.mubr.f32.vlgmr.msra.gmra.mrb[0].mxu0 %v3009_v41  ;;  %2654 = vmatprep.subr.bf16.mxu1 %v2653_v61 }
  0xc6   :  { %2420 = vmatprep.mubr.f32.mxu0 %v3015_v51  ;;  %2656 = vmatpush3.bf16.msra.mxu1 %v2653_v61 }
  0xc7   :  { %2658 = vmatprep.subr.bf16.mxu1 %v2657_v4 }
  0xc9   :  { %2421 = vmatmul.mubr.f32.gmra.mrb[2].mxu0 %v310_v12 }
  0xca   :  { %2660 = vmatpush3.bf16.msra.mxu1 %v2657_v4 }
  0xcb   :  { %2662 = vmatprep.subr.bf16.mxu1 %v2661_v8 }
  0xce   :  { %2664 = vmatpush3.bf16.msra.mxu1 %v2661_v8 }
  0xcf   :  { %2666 = vmatprep.subr.bf16.mxu1 %v2665_v27 }
  0xd2   :  { %2668 = vmatpush3.bf16.msra.mxu1 %v2665_v27 }
  0xd3   :  { %2670 = vmatprep.subr.bf16.mxu1 %v2669_v33 }
  0xd6   :  { %2672 = vmatpush3.bf16.msra.mxu1 %v2669_v33  ;;  %v26_v33 = vld [vmem:[%s3584_s1 + $0x50] sm:$0xff] }
  0xd7   :  { %2674 = vmatprep.subr.bf16.mxu1 %v3109_v40 }
 0x198   :  { %v2419_v34 = vpop.f32.mrb[0].mxu0 }
 0x199   :  { %vm854_vm9 = vcmp.ge.f32.partialorder %v2419_v34, %v852_v28  ;;  %v827_v35 = vpop.f32.mrb[1].mxu0  ;;  %v27_v34 = vld [vmem:[%s3584_s1 + $0x58] sm:$0xff] }
 0x19a   :  { %v2122_v39 = vsel %vm854_vm9, 1.0, %v2855_v38  ;;  %vm853_vm10 = vcmp.ge.f32.partialorder %v827_v35, %v852_v28 }
 0x19b   :  { %v886_v41 = vrot.slane %v2122_v39, 1  ;;  %v2121_v43 = vsel %vm853_vm10, 1.0, %v2855_v38  ;;  %v870_v44 = vrot.slane %v2122_v39, 7 }
 0x19c   :  { %v2777_v45 = vpack.i.bf16 %v2122_v39, %v2121_v43  ;;  %v869_v46 = vrot.slane %v2121_v43, 7  ;;  %v885_v47 = vrot.slane %v2121_v43, 1  ;;  %v2422_v48 = vpop.f32.mrb[2].mxu0 }
 0x19d   :  { %vm856_vm11 = vcmp.ge.f32.partialorder %v2422_v48, %v852_v28  ;;  %v839_v49 = vpop.f32.mrb[3].mxu0  ;;  %v30_v48 = vld [vmem:[%s3584_s1 + $0x70] sm:$0xff] }
 0x19e   :  { %v2124_v50 = vsel %vm856_vm11, 1.0, %v2855_v38  ;;  %vm855_vm12 = vcmp.ge.f32.partialorder %v839_v49, %v852_v28  ;;  %2778 = vrot.lane.b32.xlu0 %v2777_v45, %s2854_s18  ;;  %v887_v51 = vsel %vm133_vm0, %v885_v47, %v886_v41  ;;  %v871_v60 = vsel %vm108_vm3, %v869_v46, %v870_v44  ;;  %v29_v47 = vld [vmem:[%s3584_s1 + $0x68] sm:$0xff]  ;;  %v31_v49 = vld [vmem:[%s3584_s1 + $0x78] sm:$0xff] }
 0x19f   :  { %v874_v53 = vrot.slane %v2124_v50, 7  ;;  %v890_v54 = vrot.slane %v2124_v50, 1  ;;  %v2123_v55 = vsel %vm855_vm12, 1.0, %v2855_v38  ;;  %v880_v52 = vsel %vm108_vm3, 0.0, %v869_v46  ;;  %v28_v46 = vld [vmem:[%s3584_s1 + $0x60] sm:$0xff] }
 0x1a0   :  { %v2787_v56 = vpack.i.bf16 %v2124_v50, %v2123_v55  ;;  %v872_v57 = vrot.slane %v2123_v55, 7  ;;  %v888_v58 = vrot.slane %v2123_v55, 1  ;;  %v881_v7 = vsel %vm86_vm4, %v880_v52, 0.0  ;;  %v46_v55 = vld [vmem:[%s3584_s1 + $0xf0] sm:$0xff] }
 0x1a1   :  { %v896_v11 = vsel %vm133_vm0, %v890_v54, 0.0  ;;  %v2681_v45 = vpack.c.bf16 %v27_v34, %v26_v33  ;;  %v2689_v50 = vpack.c.bf16 %v31_v49, %v30_v48  ;;  %v62_v52 = vld [vmem:[%s3584_s1 + $0x170] sm:$0xff]  ;;  %v1333_v33 = vsub.s32 3, %v2896_v6 }
 0x1a2   :  { %2788 = vrot.lane.b32.xlu0 %v2787_v56, %s2854_s18  ;;  %v889_v12 = vsel %vm133_vm0, %v886_v41, %v888_v58  ;;  %v891_v14 = vsel %vm133_vm0, %v888_v58, %v890_v54  ;;  %v900_v15 = vsel %vm3587_vm2, %v896_v11, 0.0  ;;  %v873_v16 = vsel %vm108_vm3, %v870_v44, %v872_v57  ;;  %v47_v56 = vld [vmem:[%s3584_s1 + $0xf8] sm:$0xff]  ;;  %v60_v58 = vld [vmem:[%s3584_s1 + $0x160] sm:$0xff] }
 0x1a3   :  { %v898_v17 = vsel %vm91_vm1, %v889_v12, 0.0  ;;  %v2792_v18 = vpack.i.bf16 %v900_v15, %v891_v14  ;;  %v875_v21 = vsel %vm108_vm3, %v872_v57, %v874_v53  ;;  %v883_v35 = vsel %vm3588_vm8, %v873_v16, 0.0  ;;  %v33_v53 = vld [vmem:[%s3584_s1 + $0x88] sm:$0xff] }
 0x1a4   :  { %v2782_v22 = vpack.i.bf16 %v898_v17, %v887_v51  ;;  %v32_v51 = vld [vmem:[%s3584_s1 + $0x80] sm:$0xff]  ;;  %v2697_v57 = vpack.c.bf16 %v47_v56, %v46_v55  ;;  %v2857_v14 = vmov 1.0|1.0   ;;  %v50_v17 = vld [vmem:[%s3584_s1 + $0x110] sm:$0xff]  ;;  %v1334_v34 = vrot.slane %v3093_v26, %v1333_v33 }
 0x1a5   :  { %v2693_v54 = vpack.c.bf16 %v33_v53, %v32_v51  ;;  %vm78_vm12 = vcmp.ge.s32.totalorder %v2981_v10, 3  ;;  %vm1889_vm2 = vcmask 1045504   ;;  %vm99_vm8 = vcmp.lt.s32.totalorder %v2913_v13, 13 }
 0x1a6   :  { %2783 = vrot.lane.b32.xlu1 %v2782_v22, %s2856_s4  ;;  %v61_v22 = vld [vmem:[%s3584_s1 + $0x168] sm:$0xff] }
 0x1aa   :  { %2793 = vrot.lane.b32.xlu1 %v2792_v18, %s2856_s4  ;;  %v51_v18 = vld [vmem:[%s3584_s1 + $0x118] sm:$0xff] }
 0x210   :  { %v2779_v29 = vpop.permute.xlu0 %2778 }
 0x211   :  { %v2781_v30 = vunpack.i.h.bf16 %v2779_v29  ;;  %v2780_v59 = vunpack.i.l.bf16 %v2779_v29 }
 0x213   :  { %v929_v24 = vsel %vm3586_vm6, %v881_v7, %v2780_v59  ;;  %v930_v25 = vsel %vm3586_vm6, %v871_v60, %v2781_v30  ;;  %v1123_v60 = vsub.s32 1, %v2896_v6  ;;  %v2713_v30 = vpack.c.bf16 %v51_v18, %v50_v17 }
 0x214   :  { %v2789_v42 = vpop.permute.xlu0 %2788 }
 0x215   :  { %v2791_v8 = vunpack.i.h.bf16 %v2789_v42  ;;  %v2790_v23 = vunpack.i.l.bf16 %v2789_v42  ;;  %v3200_v11 = vrot.slane %v3093_v26, %v1123_v60  ;;  %v63_v42 = vld [vmem:[%s3584_s1 + $0x178] sm:$0xff] }
 0x217   :  { %v931_v39 = vsel %vm3586_vm6, %v883_v35, %v2790_v23  ;;  %v932_v41 = vsel %vm3586_vm6, %v875_v21, %v2791_v8 }
 0x218   :  { %v2784_v61 = vpop.permute.xlu1 %2783 }
 0x219   :  { %v2786_v4 = vunpack.i.h.bf16 %v2784_v61  ;;  %v2785_v5 = vunpack.i.l.bf16 %v2784_v61 }
 0x21b   :  { %v934_v27 = vsel %vm933_vm13, %v929_v24, %v2785_v5  ;;  %v935_v28 = vsel %vm933_vm13, %v930_v25, %v2786_v4  ;;  %v2717_v4 = vpack.c.bf16 %v53_v63, %v52_v62  ;;  %v54_v24 = vld [vmem:[%s3584_s1 + $0x130] sm:$0xff]  ;;  %v55_v25 = vld [vmem:[%s3584_s1 + $0x138] sm:$0xff] }
 0x21c   :  { %v2794_v32 = vpop.permute.xlu1 %2793  ;;  %2447 = vmatprep.mubr.msk.f32.mxu1 %vm938_vm14, %v934_v27 }
 0x21d   :  { %v2796_v36 = vunpack.i.h.bf16 %v2794_v32  ;;  %v2795_v37 = vunpack.i.l.bf16 %v2794_v32  ;;  %2448 = vmatmul.mubr.msk.f32.vlgmr.msra.gmra.mrb[0].mxu1 %vm938_vm14, %v935_v28  ;;  %2718 = vmatprep.subr.bf16.mxu0 %v2717_v4 }
 0x21e   :  { %2676 = vmatpush3.bf16.msra.mxu1 %v3109_v40  ;;  %v2685_v40 = vpack.c.bf16 %v29_v47, %v28_v46  ;;  %2720 = vmatpush3.bf16.msra.mxu0 %v2717_v4 }
 0x21f   :  { %v936_v43 = vsel %vm933_vm13, %v931_v39, %v2795_v37  ;;  %2678 = vmatprep.subr.bf16.mxu1 %v2677_v31  ;;  %v937_v44 = vsel %vm933_vm13, %v932_v41, %v2796_v36  ;;  %v58_v41 = vld [vmem:[%s3584_s1 + $0x150] sm:$0xff] }
 0x220   :  { %2450 = vmatprep.mubr.msk.f32.mxu1 %vm938_vm14, %v936_v43 }
 0x221   :  { %2451 = vmatmul.mubr.msk.f32.gmra.mrb[2].mxu1 %vm938_vm14, %v937_v44 }
 0x222   :  { %2680 = vmatpush3.bf16.msra.mxu1 %v2677_v31  ;;  %2477 = vmatprep.mubr.msk.f32.mxu1 %vm938_vm14, %v934_v27  ;;  %v2721_v27 = vpack.c.bf16 %v55_v25, %v54_v24  ;;  %v57_v31 = vld [vmem:[%s3584_s1 + $0x148] sm:$0xff] }
 0x223   :  { %2682 = vmatprep.subr.bf16.mxu1 %v2681_v45 }
 0x224   :  { %2722 = vmatprep.subr.bf16.mxu0 %v2721_v27 }
 0x225   :  { %2724 = vmatpush3.bf16.msra.mxu0 %v2721_v27 }
 0x226   :  { %2684 = vmatpush3.bf16.msra.mxu1 %v2681_v45 }
 0x227   :  { %2686 = vmatprep.subr.bf16.mxu1 %v2685_v40 }
 0x22a   :  { %2688 = vmatpush3.bf16.msra.mxu1 %v2685_v40 }
 0x22b   :  { %2690 = vmatprep.subr.bf16.mxu1 %v2689_v50 }
 0x22e   :  { %2692 = vmatpush3.bf16.msra.mxu1 %v2689_v50 }
 0x22f   :  { %2694 = vmatprep.subr.bf16.mxu1 %v2693_v54 }
 0x232   :  { %2696 = vmatpush3.bf16.msra.mxu1 %v2693_v54 }
 0x233   :  { %2698 = vmatprep.subr.bf16.mxu1 %v2697_v57 }
 0x235   :  { %2478 = vmatmul.mubr.msk.f32.vlgmr.msra.gmra.mrb[0].mxu1 %vm938_vm14, %v935_v28  ;;  %v56_v28 = vld [vmem:[%s3584_s1 + $0x140] sm:$0xff] }
 0x236   :  { %2480 = vmatprep.mubr.msk.f32.mxu1 %vm938_vm14, %v936_v43  ;;  %2700 = vmatpush3.bf16.msra.mxu1 %v2697_v57  ;;  %v2733_v32 = vpack.c.bf16 %v57_v31, %v56_v28  ;;  %v59_v43 = vld [vmem:[%s3584_s1 + $0x158] sm:$0xff]  ;;  %v64_v57 = vld [vmem:[%s3584_s1 + $0x180] sm:$0xff] }
 0x237   :  { %v2737_v48 = vpack.c.bf16 %v59_v43, %v58_v41 }
 0x238   :  { %2734 = vmatprep.subr.bf16.mxu0 %v2733_v32 }
 0x239   :  { %2481 = vmatmul.mubr.msk.f32.gmra.mrb[2].mxu1 %vm938_vm14, %v937_v44  ;;  %vm1763_vm14 = vcmask 1042432  }
 0x23a   :  { %2487 = vmatprep.mubr.msk.f32.mxu1 %vm186_vm5, %v2879_v0 }
 0x23d   :  { %2488 = vmatmul.mubr.msk.f32.vlgmr.msra.gmra.mrb[4].mxu1 %vm186_vm5, %v2884_v1 }
 0x23e   :  { %2490 = vmatprep.mubr.msk.f32.mxu1 %vm186_vm5, %v2889_v2  ;;  %v48_v2 = vld [vmem:[%s3584_s1 + $0x100] sm:$0xff] }
 0x241   :  { %2491 = vmatmul.mubr.msk.f32.gmra.mrb[6].mxu1 %vm186_vm5, %v2903_v9  ;;  %v49_v9 = vld [vmem:[%s3584_s1 + $0x108] sm:$0xff] }
 0x242   :  { %2501 = vmatprep.mubr.msk.f32.mxu1 %vm3586_vm6, %v60_v58  ;;  %v2709_v16 = vpack.c.bf16 %v49_v9, %v48_v2  ;;  %v1438_v58 = vsub.s32 4, %v2896_v6 }
 0x244   :  { %v1439_v60 = vrot.slane %v3093_v26, %v1438_v58 }
 0x308   :  { %v3202_v0 = vpop.f32.mrb[0].mxu1 }
 0x309   :  { %vm1126_vm15 = vcmp.ge.f32.partialorder %v3202_v0, %v3200_v11  ;;  %v3206_v1 = vpop.f32.mrb[1].mxu1 }
 0x30a   :  { %vm1125_vm5 = vcmp.ge.f32.partialorder %v3206_v1, %v3200_v11  ;;  %v3312_v54 = vsel %vm1126_vm15, 1.0, %v2855_v38 }
 0x30b   :  { %vm2701_vm7 = vmpackc.low %vm1126_vm15, %vm1125_vm5  ;;  %v3303_v53 = vsel %vm1125_vm5, 1.0, %v2855_v38  ;;  %vm1799_vm15 = vcmask 1041408  }
 0x30c   :  { %v3222_v12 = vpop.f32.mrb[2].mxu1  ;;  %2702 = vmatprep.subr.msk.bf16.mxu1 %vm2701_vm7, %v2857_v14 }
 0x30d   :  { %vm1128_vm9 = vcmp.ge.f32.partialorder %v3222_v12, %v3200_v11  ;;  %v3227_v15 = vpop.f32.mrb[3].mxu1  ;;  %2704 = vmatpush3.bf16.msk.msra.mxu1 %vm2701_vm7, %v2857_v14 }
 0x30e   :  { %vm1127_vm10 = vcmp.ge.f32.partialorder %v3227_v15, %v3200_v11  ;;  %v3328_v56 = vsel %vm1128_vm9, 1.0, %v2855_v38 }
 0x30f   :  { %vm2705_vm11 = vmpackc.low %vm1128_vm9, %vm1127_vm10  ;;  %v3318_v55 = vsel %vm1127_vm10, 1.0, %v2855_v38  ;;  %v3339_v38 = vand.u32 127, %v69_v3  ;;  %vm80_vm9 = vcmp.ge.s32.totalorder %v2991_v20, 3  ;;  %vm84_vm10 = vcmp.ge.s32.totalorder %v2991_v20, 2 }
 0x310   :  { %2706 = vmatprep.subr.msk.bf16.mxu1 %vm2705_vm11, %v2857_v14  ;;  %v3245_v21 = vpop.f32.mrb[4].mxu1 }
 0x311   :  { %2708 = vmatpush3.bf16.msk.msra.mxu1 %vm2705_vm11, %v2857_v14  ;;  %v3251_v29 = vpop.f32.mrb[5].mxu1  ;;  %vm1751_vm13 = vcmp.eq.s32.totalorder %v3339_v38, 3  ;;  %vm1758_vm5 = vcmp.eq.s32.totalorder %v3339_v38, 0  ;;  %vm1798_vm7 = vcmp.eq.s32.totalorder %v3339_v38, 1  ;;  %vm82_vm11 = vcmp.ge.s32.totalorder %v2981_v10, 2 }
 0x312   :  { %2710 = vmatprep.subr.bf16.mxu1 %v2709_v16 }
 0x314   :  { %2502 = vmatmul.mubr.msk.f32.vlgmr.msra.gmra.mrb[8].mxu1 %vm3586_vm6, %v61_v22  ;;  %v3257_v59 = vpop.f32.mrb[6].mxu1 }
 0x315   :  { %2504 = vmatprep.mubr.msk.f32.mxu1 %vm3586_vm6, %v62_v52  ;;  %v3263_v61 = vpop.f32.mrb[7].mxu1  ;;  %2712 = vmatpush3.bf16.msra.mxu1 %v2709_v16 }
 0x316   :  { %2714 = vmatprep.subr.bf16.mxu1 %v2713_v30 }
 0x318   :  { %2505 = vmatmul.mubr.msk.f32.gmra.mrb[10].mxu1 %vm3586_vm6, %v63_v42 }
 0x319   :  { %2716 = vmatpush3.bf16.msra.mxu1 %v2713_v30 }
 0x3e7   :  { %v2503_v5 = vpop.f32.mrb[8].mxu1 }
 0x3e8   :  { %v1312_v7 = vpop.f32.mrb[9].mxu1 }
 0x3e9   :  { %2515 = vmatprep.mubr.msk.f32.mxu1 %vm3586_vm6, %v1312_v7 }
 0x3ea   :  { %2516 = vmatmul.mubr.msk.f32.vlgmr.msra.gmra.mrb[12].mxu1 %vm3586_vm6, %v2503_v5 }
 0x3eb   :  { %v2506_v8 = vpop.f32.mrb[10].mxu1 }
 0x3ec   :  { %v1322_v23 = vpop.f32.mrb[11].mxu1 }
 0x3ed   :  { %2518 = vmatprep.mubr.msk.f32.mxu1 %vm3586_vm6, %v1322_v23 }
 0x3ee   :  { %2519 = vmatmul.mubr.msk.f32.gmra.mrb[14].mxu1 %vm3586_vm6, %v2506_v8 }
 0x3ef   :  { %2543 = vmatprep.mubr.msk.f32.mxu1 %vm3586_vm6, %v64_v57 }
 0x4bd   :  { %v2517_v35 = vpop.f32.mrb[12].mxu1 }
 0x4be   :  { %v1419_v36 = vadd.f32 %v2517_v35, %v1334_v34  ;;  %v1413_v37 = vpop.f32.mrb[13].mxu1 }
 0x4bf   :  { %v1414_v39 = vadd.f32 %v1413_v37, %v1334_v34 }
 0x4c0   :  { %v1433_v46 = vmax.f32 %v1419_v36, 0.0 }
 0x4c1   :  { %v1432_v44 = vmax.f32 %v1414_v39, 0.0  ;;  %v2520_v45 = vpop.f32.mrb[14].mxu1 }
 0x4c2   :  { %v1429_v47 = vadd.f32 %v2520_v45, %v1334_v34  ;;  %v1423_v40 = vpop.f32.mrb[15].mxu1 }
 0x4c3   :  { %v1424_v49 = vadd.f32 %v1423_v40, %v1334_v34  ;;  %2529 = vmatprep.mubr.msk.f32.mxu0 %vm3586_vm6, %v1432_v44 }
 0x4c4   :  { %2530 = vmatmul.mubr.msk.f32.vlgmr.msra.gmra.mrb[4].mxu0 %vm3586_vm6, %v1433_v46  ;;  %v1435_v51 = vmax.f32 %v1429_v47, 0.0 }
 0x4c5   :  { %v1434_v50 = vmax.f32 %v1424_v49, 0.0  ;;  %2736 = vmatpush3.bf16.msra.mxu0 %v2733_v32 }
 0x4c6   :  { %2738 = vmatprep.subr.bf16.mxu0 %v2737_v48 }
 0x4c7   :  { %2532 = vmatprep.mubr.msk.f32.mxu0 %vm3586_vm6, %v1434_v50 }
 0x4c8   :  { %2533 = vmatmul.mubr.msk.f32.gmra.mrb[6].mxu0 %vm3586_vm6, %v1435_v51 }
 0x4c9   :  { %2740 = vmatpush3.bf16.msra.mxu0 %v2737_v48  ;;  %2557 = vmatprep.mubr.msk.f32.mxu0 %vm3586_vm6, %v3303_v53 }
 0x4cc   :  { %2558 = vmatmul.mubr.msk.f32.vlgmr.msra.gmra.mrb[8].mxu0 %vm3586_vm6, %v3312_v54 }
 0x4cd   :  { %2560 = vmatprep.mubr.msk.f32.mxu0 %vm3586_vm6, %v3318_v55 }
 0x4d0   :  { %2561 = vmatmul.mubr.msk.f32.gmra.mrb[10].mxu0 %vm3586_vm6, %v3328_v56  ;;  %vm1924_vm6 = vcmp.eq.s32.totalorder %v3339_v38, 6 }
 0x597   :  { %v2531_v0 = vpop.f32.mrb[4].mxu0 }
 0x598   :  { %v1524_v1 = vadd.f32 %v2531_v0, %v1439_v60  ;;  %v1518_v2 = vpop.f32.mrb[5].mxu0 }
 0x599   :  { %v1519_v9 = vadd.f32 %v1518_v2, %v1439_v60 }
 0x59a   :  { %v1538_v11 = vsub.f32 0.0, %v1524_v1 }
 0x59b   :  { %v1537_v12 = vsub.f32 0.0, %v1519_v9  ;;  %v2534_v15 = vpop.f32.mrb[6].mxu0 }
 0x59c   :  { %v1543_v16 = vmul.f32 1.442695, %v1538_v11  ;;  %v1534_v17 = vadd.f32 %v2534_v15, %v1439_v60  ;;  %v1528_v18 = vpop.f32.mrb[7].mxu0 }
 0x59d   :  { %v1541_v22 = vmul.f32 1.442695, %v1537_v12  ;;  %v1529_v52 = vadd.f32 %v1528_v18, %v1439_v60 }
 0x59e   :  { %2797 = vpow2.f32 %v1543_v16  ;;  %v1540_v30 = vsub.f32 0.0, %v1534_v17 }
 0x59f   :  { %2799 = vpow2.f32 %v1541_v22  ;;  %v1539_v42 = vsub.f32 0.0, %v1529_v52  ;;  %v3343_v3 = vpop.f32.mrb[8].mxu0 }
 0x5a0   :  { %v1547_v62 = vmul.f32 1.442695, %v1540_v30  ;;  %v1755_v63 = vsel %vm1751_vm13, %v3343_v3, 0.0  ;;  %v1765_v4 = vrot.slane %v3343_v3, 5  ;;  %v1801_v5 = vrot.slane %v3343_v3, 6  ;;  %v3353_v7 = vpop.f32.mrb[9].mxu0 }
 0x5a1   :  { %v1545_v8 = vmul.f32 1.442695, %v1539_v42  ;;  %v1836_v23 = vrot.slane %v3343_v3, 7  ;;  %v1863_v24 = vrot.slane %v3343_v3, 1  ;;  %v1891_v25 = vrot.slane %v3343_v3, 2 }
 0x5a2   :  { %2801 = vpow2.f32 %v1547_v62  ;;  %v1754_v27 = vsel %vm1751_vm13, %v3353_v7, 0.0  ;;  %v1764_v28 = vrot.slane %v3353_v7, 5  ;;  %v1800_v31 = vrot.slane %v3353_v7, 6 }
 0x5a3   :  { %2803 = vpow2.f32 %v1545_v8  ;;  %v1835_v32 = vrot.slane %v3353_v7, 7  ;;  %v1862_v33 = vrot.slane %v3353_v7, 1  ;;  %v1890_v34 = vrot.slane %v3353_v7, 2  ;;  %v3367_v35 = vpop.f32.mrb[10].mxu0 }
 0x5a4   :  { %v1766_v36 = vsel %vm1763_vm14, %v1764_v28, %v1765_v4  ;;  %v1775_v37 = vsel %vm1763_vm14, 0.0, %v1764_v28  ;;  %v1802_v39 = vsel %vm1799_vm15, %v1800_v31, %v1801_v5  ;;  %v1811_v41 = vsel %vm1799_vm15, 0.0, %v1800_v31  ;;  %v3374_v43 = vpop.f32.mrb[11].mxu0 }
 0x5a5   :  { %v1784_v44 = vsel %vm78_vm12, %v1775_v37, 0.0  ;;  %v1791_v45 = vsel %vm1758_vm5, %v1766_v36, 0.0  ;;  %v1837_v46 = vsel %vm108_vm3, %v1835_v32, %v1836_v23  ;;  %v3386_v47 = vsel %vm1751_vm13, %v3367_v35, 0.0 }
 0x5a6   :  { %v1790_v40 = vsel %vm1758_vm5, %v1784_v44, 0.0  ;;  %v1795_v48 = vadd.f32 %v1791_v45, %v1755_v63  ;;  %v1769_v49 = vrot.slane %v3367_v35, 5  ;;  %v1805_v50 = vrot.slane %v3367_v35, 6 }
 0x5a7   :  { %v1794_v51 = vadd.f32 %v1790_v40, %v1754_v27  ;;  %v1840_v57 = vrot.slane %v3367_v35, 7  ;;  %v1867_v58 = vrot.slane %v3367_v35, 1  ;;  %v1895_v60 = vrot.slane %v3367_v35, 2 }
 0x5a8   :  { %vm1861_vm12 = vcmp.eq.s32.totalorder %v3339_v38, 4  ;;  %v2798_v0 = vpop.eup %2797  ;;  %v1756_v1 = vsel %vm1751_vm13, %v3374_v43, 0.0  ;;  %v1767_v2 = vrot.slane %v3374_v43, 5  ;;  %v1803_v9 = vrot.slane %v3374_v43, 6 }
 0x5a9   :  { %v1827_v11 = vsel %vm1798_vm7, %v1802_v39, 0.0  ;;  %v2800_v12 = vpop.eup %2799  ;;  %v1550_v15 = vadd.f32 1.0, %v2798_v0  ;;  %v1838_v17 = vrot.slane %v3374_v43, 7  ;;  %v1865_v18 = vrot.slane %v3374_v43, 1 }
 0x5aa   :  { %v1831_v16 = vadd.f32 %v1827_v11, %v1795_v48  ;;  %v1549_v22 = vadd.f32 1.0, %v2800_v12  ;;  %v1768_v52 = vsel %vm1763_vm14, %v1765_v4, %v1767_v2  ;;  %v1770_v30 = vsel %vm1763_vm14, %v1767_v2, %v1769_v49 }
 0x5ab   :  { %v1804_v42 = vsel %vm1799_vm15, %v1801_v5, %v1803_v9  ;;  %vm1925_vm13 = vcmask 1044480   ;;  %2805 = vrcp.f32 %v1550_v15  ;;  %v1786_v62 = vsel %vm80_vm9, %v1768_v52, 0.0 }
 0x5ac   :  { %v3416_v63 = vsel %vm1758_vm5, %v1770_v30, 0.0  ;;  %v3419_v8 = vsel %vm1799_vm15, %v1803_v9, %v1805_v50  ;;  %v2802_v4 = vpop.eup %2801  ;;  %2807 = vrcp.f32 %v1549_v22  ;;  %v1792_v5 = vsel %vm1758_vm5, %v1786_v62, 0.0 }
 0x5ad   :  { %v1822_v27 = vsel %vm84_vm10, %v1804_v42, 0.0  ;;  %v1839_v28 = vsel %vm108_vm3, %v1836_v23, %v1838_v17  ;;  %v2804_v31 = vpop.eup %2803  ;;  %v1552_v36 = vadd.f32 1.0, %v2802_v4  ;;  %v1796_v37 = vadd.f32 %v1792_v5, %v1756_v1 }
 0x5ae   :  { %v1828_v39 = vsel %vm1798_vm7, %v1822_v27, 0.0  ;;  %v1866_v44 = vsel %vm133_vm0, %v1863_v24, %v1865_v18  ;;  %v1551_v45 = vadd.f32 1.0, %v2804_v31  ;;  %v1893_v48 = vrot.slane %v3374_v43, 2 }
 0x5af   :  { %v1875_v40 = vsel %vm91_vm1, %v1866_v44, 0.0  ;;  %v1929_v49 = vrot.slane %v3374_v43, 3  ;;  %2809 = vrcp.f32 %v1552_v36  ;;  %v1832_v23 = vadd.f32 %v1828_v39, %v1796_v37 }
 0x5b0   :  { %v1820_v50 = vsel %vm82_vm11, %v1811_v41, 0.0  ;;  %v1846_v0 = vsel %vm108_vm3, 0.0, %v1835_v32  ;;  %2811 = vrcp.f32 %v1551_v45  ;;  %vm3589_vm1 = vcmp.eq.s32.totalorder %v3339_v38, 2 }
 0x5b1   :  { %v1826_v1 = vsel %vm1798_vm7, %v1820_v50, 0.0  ;;  %v1847_v2 = vsel %vm86_vm4, %v1846_v0, 0.0  ;;  %v1854_v9 = vsel %vm3589_vm1, %v1837_v46, 0.0  ;;  %vm3590_vm14 = vmmov %vm3589_vm1  ;;  %v1864_v32 = vsel %vm133_vm0, %v1862_v33, %v1863_v24 }
 0x5b2   :  { %v1830_v11 = vadd.f32 %v1826_v1, %v1794_v51  ;;  %v1853_v12 = vsel %vm3590_vm14, %v1847_v2, 0.0  ;;  %v1881_v41 = vsel %vm1861_vm12, %v1875_v40, 0.0  ;;  %v1880_v10 = vsel %vm1861_vm12, %v1864_v32, 0.0  ;;  %vm3596_vm14 = vmmov %vm3589_vm1 }
 0x5b3   :  { %v1892_v46 = vsel %vm1889_vm2, %v1890_v34, %v1891_v25  ;;  %v1894_v51 = vsel %vm1889_vm2, %v1891_v25, %v1893_v48  ;;  %v1926_v15 = vrot.slane %v3353_v7, 3  ;;  %vm97_vm4 = vcmp.lt.s32.totalorder %v2927_v19, 14 }
 0x5b4   :  { %v1857_v24 = vadd.f32 %v1853_v12, %v1830_v11  ;;  %vm3591_vm15 = vcmp.lt.s32.totalorder %v2913_v13, 14  ;;  %vm3592_vm5 = vcmp.eq.s32.totalorder %v3339_v38, 5  ;;  %v1927_v52 = vrot.slane %v3343_v3, 3 }
 0x5b5   :  { %v1911_v33 = vsel %vm3591_vm15, %v1894_v51, 0.0  ;;  %v1916_v22 = vsel %vm3592_vm5, %v1892_v46, 0.0  ;;  %vm3593_vm9 = vmmov %vm3592_vm5  ;;  %v1858_v30 = vadd.f32 %v1854_v9, %v1831_v16  ;;  %vm3594_vm10 = vcmp.ge.s32.totalorder %v2991_v20, 1  ;;  %v2806_v42 = vpop.eup %2805 }
 0x5b6   :  { %v1917_v34 = vsel %vm3593_vm9, %v1911_v33, 0.0  ;;  %v1849_v25 = vsel %vm3594_vm10, %v1839_v28, 0.0  ;;  %v1868_v7 = vsel %vm133_vm0, %v1865_v18, %v1867_v58  ;;  %vm101_vm11 = vcmp.lt.s32.totalorder %v2927_v19, 13  ;;  %v2808_v27 = vpop.eup %2807 }
 0x5b7   :  { %v1884_v62 = vadd.f32 %v1880_v10, %v1857_v24  ;;  %v1928_v4 = vsel %vm1925_vm13, %v1926_v15, %v1927_v52  ;;  %v1930_v5 = vsel %vm1925_vm13, %v1927_v52, %v1929_v49  ;;  %v1855_v3 = vsel %vm3589_vm1, %v1849_v25, 0.0  ;;  %v65_v15 = vld [vmem:[%s3584_s1 + $0x188] sm:$0xff]  ;;  %v67_v52 = vld [vmem:[%s3584_s1 + $0x198] sm:$0xff] }
 0x5b8   :  { %v1947_v20 = vsel %vm99_vm8, %v1930_v5, 0.0  ;;  %v1952_v16 = vsel %vm1924_vm6, %v1928_v4, 0.0  ;;  %v1885_v28 = vadd.f32 %v1881_v41, %v1858_v30  ;;  %v1859_v18 = vadd.f32 %v1855_v3, %v1832_v23  ;;  %vm3595_vm8 = vmmov %vm3592_vm5 }
 0x5b9   :  { %v2725_v31 = vpack.c.bf16 %v2806_v42, %v2808_v27  ;;  %v1920_v36 = vadd.f32 %v1916_v22, %v1884_v62  ;;  %v1953_v37 = vsel %vm1924_vm6, %v1947_v20, 0.0  ;;  %v1882_v39 = vsel %vm1861_vm12, %v1868_v7, 0.0  ;;  %v2810_v50 = vpop.eup %2809 }
 0x5ba   :  { %v1921_v44 = vadd.f32 %v1917_v34, %v1885_v28  ;;  %v1886_v45 = vadd.f32 %v1882_v39, %v1859_v18  ;;  %v1896_v13 = vsel %vm1889_vm2, %v1893_v48, %v1895_v60  ;;  %v1931_v40 = vrot.slane %v3367_v35, 3  ;;  %v2812_v9 = vpop.eup %2811 }
 0x5bb   :  { %2726 = vmatprep.subr.bf16.mxu1 %v2725_v31  ;;  %v1956_v0 = vadd.f32 %v1952_v16, %v1920_v36  ;;  %v1918_v23 = vsel %vm3595_vm8, %v1896_v13, 0.0  ;;  %v1797_v1 = vadd.f32 %v3416_v63, %v3386_v47  ;;  %v1829_v2 = vsel %vm1798_vm7, %v3419_v8, 0.0 }
 0x5bc   :  { %2728 = vmatpush3.bf16.msra.mxu1 %v2725_v31  ;;  %v1957_v11 = vadd.f32 %v1953_v37, %v1921_v44  ;;  %v1922_v12 = vadd.f32 %v1918_v23, %v1886_v45  ;;  %v1932_v48 = vsel %vm1925_vm13, %v1929_v49, %v1931_v40  ;;  %v1841_v32 = vsel %vm108_vm3, %v1838_v17, %v1840_v57 }
 0x5bd   :  { %v2729_v41 = vpack.c.bf16 %v2810_v50, %v2812_v9  ;;  %v1954_v47 = vsel %vm1924_vm6, %v1932_v48, 0.0  ;;  %v1833_v63 = vadd.f32 %v1829_v2, %v1797_v1  ;;  %v1856_v8 = vsel %vm3596_vm14, %v1841_v32, 0.0 }
 0x5be   :  { %v1958_v10 = vadd.f32 %v1954_v47, %v1922_v12  ;;  %v1873_v46 = vsel %vm133_vm0, %v1867_v58, 0.0  ;;  %v1901_v49 = vsel %vm1889_vm2, %v1895_v60, 0.0  ;;  %v1937_v43 = vsel %vm1925_vm13, %v1931_v40, 0.0  ;;  %v66_v58 = vld [vmem:[%s3584_s1 + $0x190] sm:$0xff]  ;;  %vm3598_vm0 = vmmov %vm3592_vm5  ;;  %s2858_s1 = smov [#allocation2]  }
 0x5bf   :  { %2730 = vmatprep.subr.bf16.mxu1 %v2729_v41  ;;  %v1860_v57 = vadd.f32 %v1856_v8, %v1833_v63  ;;  %vm3597_vm3 = vcmp.lt.s32.totalorder %v2927_v19, 15  ;;  %v1913_v51 = vsel %vm97_vm4, %v1901_v49, 0.0  ;;  %v1949_v24 = vsel %vm101_vm11, %v1937_v43, 0.0  ;;  %s2110_s10 = sshll.u32 %s2858_s1, 4  ;;  %s2111_s10 = int_to_ptr.vmem [resolvable:$true] %s2110_s10 }
 0x5c0   :  { %v1877_v17 = vsel %vm3597_vm3, %v1873_v46, 0.0  ;;  %2732 = vmatpush3.bf16.msra.mxu1 %v2729_v41  ;;  %v1919_v33 = vsel %vm3598_vm0, %v1913_v51, 0.0  ;;  %vm3599_vm2 = vcmask 261120   ;;  %v1955_v34 = vsel %vm1924_vm6, %v1949_v24, 0.0  ;;  %s2829_s11 = scalar_lea.vmem %s2111_s10, 512  ;;  %p2834_p1 = scmp.lt.s32.totalorder %s2111_s10, %s2111_s10 }
 0x5c1   :  { %v1883_v35 = vsel %vm1861_vm12, %v1877_v17, 0.0  ;;  %2741 = vmatprep.subr.bf16.mxu1 %v2857_v14  ;;  %vm3600_vm7 = vmmov %vm3599_vm2  ;;  %v1962_v38 = vsub.s32 5, %v2896_v6  ;;  %v1139_v12 = vsub.s32 2, %v2896_v6  ;;  %p2830_p0 = scmp.ne.s32.totalorder %s2111_s10, %s2829_s11  ;;  %p2835_p2 = scmp.lt.s32.totalorder %s2829_s11, %s2829_s11 }
 0x5c2   :  { %v1887_v60 = vadd.f32 %v1883_v35, %v1860_v57  ;;  %vm3601_vm12 = vmmov %vm3599_vm2 }
 0x5c3   :  { %2544 = vmatmul.mubr.msk.f32.vlgmr.msra.gmra.mrb[16].mxu1 %vm3599_vm2, %v65_v15  ;;  %vm3602_vm13 = vmmov %vm3599_vm2  ;;  %v1963_v62 = vrot.slane %v3093_v26, %v1962_v38  ;;  %v1140_v41 = vrot.slane %v3093_v26, %v1139_v12  ;;  %p2836_p3 = por %p2835_p2, %p2834_p1 }
 0x5c4   :  { %v1923_v22 = vadd.f32 %v1919_v33, %v1887_v60  ;;  %2742 = vmatpush3.bf16.msra.mxu1 %v2857_v14  ;;  %2546 = vmatprep.mubr.msk.f32.mxu1 %vm3600_vm7, %v66_v58  ;;  %vm3603_vm4 = vmmov %vm3599_vm2 }
 0x5c5   :  { %2743 = vmatprep.subr.bf16.mxu1 %v2857_v14  ;;  %vm3604_vm15 = vmmov %vm3599_vm2  ;;  %v1221_v17 = vadd.f32 %v3245_v21, %v1140_v41  ;;  %v1216_v6 = vadd.f32 %v3251_v29, %v1140_v41  ;;  %p2837_p4 = pnand %p2836_p3, %p2830_p0 }
 0x5c6   :  { %v1959_v19 = vadd.f32 %v1955_v34, %v1923_v22  ;;  %vm3605_vm5 = vmmov %vm3599_vm2  ;;  %v1231_v34 = vadd.f32 %v3257_v59, %v1140_v41 }
 0x5c7   :  { %2547 = vmatmul.mubr.msk.f32.gmra.mrb[18].mxu1 %vm3601_vm12, %v67_v52  ;;  %vm3606_vm6 = vmmov %vm3599_vm2 }
 0x5c8   :  { %2744 = vmatpush3.bf16.msra.mxu1 %v2857_v14  ;;  %2571 = vmatprep.mubr.msk.f32.mxu1 %vm3602_vm13, %v1956_v0  ;;  %vm3607_vm9 = vmmov %vm3599_vm2 }
 0x5c9   :  { %vm3608_vm10 = vmmov %vm3599_vm2 }
 0x5ca   :  { %vm3609_vm11 = vmmov %vm3599_vm2 }
 0x5cb   :  { %2572 = vmatmul.mubr.msk.f32.vlgmr.msra.gmra.mrb[20].mxu1 %vm3603_vm4, %v1957_v11 }
 0x5cc   :  { %2574 = vmatprep.mubr.msk.f32.mxu1 %vm3604_vm15, %v1958_v10 }
 0x5cf   :  { %2575 = vmatmul.mubr.msk.f32.gmra.mrb[22].mxu1 %vm3605_vm5, %v1959_v19 }
 0x696   :  { %v2545_v30 = vpop.f32.mrb[16].mxu1 }
 0x697   :  { %v1635_v25 = vpop.f32.mrb[17].mxu1  ;;  %v2082_v47 = vmul.f32 0.75, %v2545_v30 }
 0x698   :  { %v2081_v8 = vmul.f32 0.75, %v1635_v25 }
 0x69a   :  { %v2548_v7 = vpop.f32.mrb[18].mxu1 }
 0x69b   :  { %v1645_v42 = vpop.f32.mrb[19].mxu1  ;;  %v2084_v51 = vmul.f32 0.75, %v2548_v7 }
 0x69c   :  { %v2083_v58 = vmul.f32 0.75, %v1645_v42 }
 0x69e   :  { %v2573_v4 = vpop.f32.mrb[20].mxu1 }
 0x69f   :  { %v2048_v5 = vadd.f32 %v2573_v4, %v1963_v62  ;;  %v2042_v3 = vpop.f32.mrb[21].mxu1 }
 0x6a0   :  { %v2043_v14 = vadd.f32 %v2042_v3, %v1963_v62 }
 0x6a1   :  { %v2062_v27 = vsub.f32 0.0, %v2048_v5 }
 0x6a2   :  { %v2061_v20 = vsub.f32 0.0, %v2043_v14  ;;  %v2576_v16 = vpop.f32.mrb[22].mxu1 }
 0x6a3   :  { %v2067_v28 = vmul.f32 1.442695, %v2062_v27  ;;  %v2058_v18 = vadd.f32 %v2576_v16, %v1963_v62  ;;  %v2052_v31 = vpop.f32.mrb[23].mxu1 }
 0x6a4   :  { %v2065_v36 = vmul.f32 1.442695, %v2061_v20  ;;  %v2053_v37 = vadd.f32 %v2052_v31, %v1963_v62 }
 0x6a5   :  { %2813 = vpow2.f32 %v2067_v28  ;;  %v2064_v39 = vsub.f32 0.0, %v2058_v18 }
 0x6a6   :  { %2815 = vpow2.f32 %v2065_v36  ;;  %v2063_v44 = vsub.f32 0.0, %v2053_v37 }
 0x6a7   :  { %v2071_v45 = vmul.f32 1.442695, %v2064_v39 }
 0x6a8   :  { %v2069_v13 = vmul.f32 1.442695, %v2063_v44 }
 0x6a9   :  { %2817 = vpow2.f32 %v2071_v45 }
 0x6aa   :  { %2819 = vpow2.f32 %v2069_v13 }
 0x6af   :  { %v2814_v40 = vpop.eup %2813 }
 0x6b0   :  { %v2816_v50 = vpop.eup %2815  ;;  %v2074_v0 = vadd.f32 1.0, %v2814_v40 }
 0x6b1   :  { %v2073_v23 = vadd.f32 1.0, %v2816_v50 }
 0x6b2   :  { %2821 = vrcp.f32 %v2074_v0 }
 0x6b3   :  { %v2818_v1 = vpop.eup %2817  ;;  %2823 = vrcp.f32 %v2073_v23 }
 0x6b4   :  { %v2820_v2 = vpop.eup %2819  ;;  %v2076_v9 = vadd.f32 1.0, %v2818_v1 }
 0x6b5   :  { %v2075_v11 = vadd.f32 1.0, %v2820_v2 }
 0x6b6   :  { %2825 = vrcp.f32 %v2076_v9 }
 0x6b7   :  { %2827 = vrcp.f32 %v2075_v11 }
 0x6bc   :  { %v2822_v48 = vpop.eup %2821 }
 0x6bd   :  { %v2824_v32 = vpop.eup %2823  ;;  %v2086_v63 = vmul.f32 0.5, %v2822_v48 }
 0x6be   :  { %v2085_v10 = vmul.f32 0.5, %v2824_v32 }
 0x6bf   :  { %v2090_v46 = vadd.f32 %v2086_v63, %v2082_v47 }
 0x6c0   :  { %v2826_v49 = vpop.eup %2825  ;;  %v2089_v43 = vadd.f32 %v2085_v10, %v2081_v8 }
 0x6c1   :  { %v2828_v57 = vpop.eup %2827  ;;  %v2094_v15 = vmul.f32 %v3312_v54, %v2090_v46  ;;  %v2088_v35 = vmul.f32 0.5, %v2826_v49  ;;  %v1226_v54 = vadd.f32 %v3263_v61, %v1140_v41 }
 0x6c2   :  { %v2093_v60 = vmul.f32 %v3303_v53, %v2089_v43  ;;  %v2087_v26 = vmul.f32 0.5, %v2828_v57 }
 0x6c3   :  { %v2098_v24 = vadd.f32 %v2094_v15, %v1221_v17  ;;  %v2092_v33 = vadd.f32 %v2088_v35, %v2084_v51 }
 0x6c4   :  { %v2097_v22 = vadd.f32 %v2093_v60, %v1216_v6  ;;  %v2091_v52 = vadd.f32 %v2087_v26, %v2083_v58 }
 0x6c5   :  { %2102 = vst.msk [vmem:[#allocation2 + $0x8] sm:$0xff] %vm3606_vm6, %v2098_v24  ;;  %v2096_v21 = vmul.f32 %v3328_v56, %v2092_v33 }
 0x6c6   :  { %2101 = vst.msk [vmem:[#allocation2] sm:$0xff] %vm3607_vm9, %v2097_v22  ;;  %v2095_v29 = vmul.f32 %v3318_v55, %v2091_v52 }
 0x6c7   :  { %v2100_v53 = vadd.f32 %v2096_v21, %v1231_v34 }
 0x6c8   :  { %v2099_v19 = vadd.f32 %v2095_v29, %v1226_v54 }
 0x6c9   :  { %2104 = vst.msk [vmem:[#allocation2 + $0x18] sm:$0xff] %vm3608_vm10, %v2100_v53 }
 0x6ca   :  { %2103 = vst.msk [vmem:[#allocation2 + $0x10] sm:$0xff] %vm3609_vm11, %v2099_v19 }
 0x6cb   :  { %2840 = shalt.err (!%p2837_p4)
}
 0x6cc   :  { %s2841_s14 = scalar_lea.hbm %s3585_s2, 512 }
 0x6cd   :  { %p2842_p5 = scmp.ne.s32.totalorder %s3585_s2, %s2841_s14  ;;  %p2845_p6 = scmp.lt.u32.totalorder %s2841_s14, %s3585_s2 }
 0x6cf   :  { %p2847_p7 = pnand %p2845_p6, %p2842_p5 }
 0x6d1   :  { %2850 = shalt.err (!%p2847_p7)
}
 0x6d2   :  { %s2859_s20 = smov 128   ;;  %s2860_s0 = smov 8  }
 0x6d3   :  { %2116 = dma.vmem_to_hbm [thread:$0]  %s2111_s10, 512, %s3585_s2, [#allocation3], %s2859_s20, %s2859_s20, %s2860_s0  }
 0x6d4   :  { %2851 = dma.done.wait [#allocation3], 512  }
 0x6d5   :  { %2852 = vsyncadd [#allocation3], 4294966784 }
 0x6d6   :  { %2120 = vsyncpa [#allocation3], 1 }

</bundles_post_ra>
